<compile_context>
chip_gen: v7x
topology: tpu7x:2x2x1
jax: 0.10.0
libtpu: 0.0.40
codegen_flags: <defaults>
</compile_context>

<pallas_src>
import math
import functools

import jax
import jax.numpy as jnp
from jax import lax
from jax.experimental import pallas as pl
from jax.experimental.pallas import tpu as pltpu


# ---------------------------------------------------------------------------
# Per-generation budgets
# ---------------------------------------------------------------------------

@functools.lru_cache(maxsize=None)
def _device_config():
    """Tile / VMEM budgets: v5e/v6e have 128 MiB VMEM per core, v7x has 64 MiB."""
    phys = 64 * 1024 * 1024
    try:
        info = pltpu.get_tpu_info()
        phys = int(getattr(info, "vmem_capacity_bytes", phys))
    except Exception:
        pass
    if phys >= 100 * 1024 * 1024:      # v5e / v6e
        return {"row_tile": 512, "q_tile": 256, "vmem_limit": 80 * 1024 * 1024}
    return {"row_tile": 256, "q_tile": 128, "vmem_limit": 40 * 1024 * 1024}   # v7x


def _row_tile(m, pref):
    """Row tile for the memory-bound epilogue kernels (pref is a multiple of 16)."""
    return m if m <= pref else pref


def _q_tile(s, pref):
    """Largest multiple-of-8 divisor of s that is <= pref (else s: one full tile)."""
    if s <= pref:
        return s
    t = pref - (pref % 8)
    while t >= 8:
        if s % t == 0:
            return t
        t -= 8
    return s


def _compiler_params(semantics, vmem_limit):
    return pltpu.CompilerParams(dimension_semantics=semantics,
                                vmem_limit_bytes=vmem_limit)


# ---------------------------------------------------------------------------
# Kernel 1: fused QKV projection + multi-head self-attention
#   grid = (batch, q-tiles).  Q/K/V for the whole sequence are projected into VMEM
#   scratch once per batch (at q-tile 0) and reused by all q-tiles of that batch.
# ---------------------------------------------------------------------------

def _attn_kernel(src_ref, pos_ref, wqk_ref, bqk_ref, wv_ref, bv_ref,
                 o_ref, a_ref,
                 q_scr, k_scr, v_scr, oacc_scr,
                 *, nhead, scale, tq):
    qi = pl.program_id(1)
    s_len, d = q_scr.shape
    dh = d // nhead

    @pl.when(qi == 0)
    def _():
        src = src_ref[0]                                  # (S, D) bf16
        x = src + pos_ref[0]                              # bf16 add (VPU)
        qk = jnp.dot(x, wqk_ref[...],
                     preferred_element_type=jnp.float32) + bqk_ref[...]
        q_scr[...] = qk[:, :d].astype(q_scr.dtype)
        k_scr[...] = qk[:, d:].astype(k_scr.dtype)
        v = jnp.dot(src, wv_ref[...],
                    preferred_element_type=jnp.float32) + bv_ref[...]
        v_scr[...] = v.astype(v_scr.dtype)

    row0 = pl.multiple_of(qi * tq, 8)
    q_tile = q_scr[pl.ds(row0, tq), :]                    # (tq, D) bf16

    a_acc = jnp.zeros((tq, s_len), jnp.float32)
    for h in range(nhead):                                # static unroll over heads
        lo = h * dh
        qh = q_tile[:, lo:lo + dh]
        kh = k_scr[:, lo:lo + dh]
        vh = v_scr[:, lo:lo + dh]
        # contract the dh axis of both operands directly (no K transpose)
        s = lax.dot_general(qh, kh, (((1,), (1,)), ((), ())),
                            preferred_element_type=jnp.float32) * scale
        s = s - jnp.max(s, axis=-1, keepdims=True)
        p = jnp.exp(s)
        p = p / jnp.sum(p, axis=-1, keepdims=True)        # exact normalization
        a_acc = a_acc + p
        # per-head store into the (tq, D) f32 scratch bounds the live set to one head
        oacc_scr[:, lo:lo + dh] = jnp.dot(p.astype(vh.dtype), vh,
                                          preferred_element_type=jnp.float32)

    o_ref[0] = oacc_scr[...].astype(o_ref.dtype)          # lane-dense (tq, D) store
    a_ref[0] = (a_acc * (1.0 / nhead)).astype(a_ref.dtype)


def fused_self_attention(src, pos, wqk, bqk, wv, bv, nhead,
                         attn_map_dtype=jnp.float32):
    b, s, d = src.shape
    dh = d // nhead
    scale = 1.0 / math.sqrt(dh)
    cfg = _device_config()
    tq = _q_tile(s, cfg["q_tile"])
    n_q = s // tq

    batch_blk = lambda bi, qi: (bi, 0, 0)
    qblk = lambda bi, qi: (bi, qi, 0)
    const = lambda bi, qi: (0, 0)

    kern = functools.partial(_attn_kernel, nhead=nhead, scale=scale, tq=tq)
    return pl.pallas_call(
        kern,
        out_shape=(jax.ShapeDtypeStruct((b, s, d), jnp.bfloat16),
                   jax.ShapeDtypeStruct((b, s, s), attn_map_dtype)),
        grid=(b, n_q),
        in_specs=[pl.BlockSpec((1, s, d), batch_blk),
                  pl.BlockSpec((1, s, d), batch_blk),
                  pl.BlockSpec((d, 2 * d), const),
                  pl.BlockSpec((1, 2 * d), const),
                  pl.BlockSpec((d, d), const),
                  pl.BlockSpec((1, d), const)],
        out_specs=(pl.BlockSpec((1, tq, d), qblk),
                   pl.BlockSpec((1, tq, s), qblk)),
        scratch_shapes=[pltpu.VMEM((s, d), jnp.bfloat16),   # Q
                        pltpu.VMEM((s, d), jnp.bfloat16),   # K
                        pltpu.VMEM((s, d), jnp.bfloat16),   # V
                        pltpu.VMEM((tq, d), jnp.float32)],  # per-head output accumulator
        compiler_params=_compiler_params(("parallel", "arbitrary"), cfg["vmem_limit"]),
    )(src, pos, wqk, bqk, wv, bv)


# ---------------------------------------------------------------------------
# Kernel 2: out_proj + residual + LayerNorm1 + FFN (lin1/ReLU/lin2) + residual +
# LayerNorm2, fully fused per row tile (post-LN1 activation and (tm, dff)
# intermediate never leave VMEM).
# ---------------------------------------------------------------------------

def _block_epilogue_kernel(attn_ref, res_ref, wo_ref, bo_ref, g1_ref, be1_ref,
                           w1_ref, b1_ref, w2_ref, b2_ref, g2_ref, be2_ref,
                           o_ref, *, eps):
    # out_proj + residual + LayerNorm1
    y = jnp.dot(attn_ref[...], wo_ref[...],
                preferred_element_type=jnp.float32) + bo_ref[...]
    x = res_ref[...].astype(jnp.float32) + y
    mean = jnp.mean(x, axis=-1, keepdims=True)
    var = jnp.mean((x - mean) ** 2, axis=-1, keepdims=True)
    xn = (x - mean) * lax.rsqrt(var + eps) * g1_ref[...] + be1_ref[...]
    xb = xn.astype(jnp.bfloat16)

    # FFN + residual + LayerNorm2 (dropout is identity in eval mode)
    h = jnp.dot(xb, w1_ref[...], preferred_element_type=jnp.float32) + b1_ref[...]
    h = jnp.maximum(h, 0.0).astype(jnp.bfloat16)
    y2 = jnp.dot(h, w2_ref[...], preferred_element_type=jnp.float32) + b2_ref[...]
    r = xn + y2
    mean2 = jnp.mean(r, axis=-1, keepdims=True)
    var2 = jnp.mean((r - mean2) ** 2, axis=-1, keepdims=True)
    rn = (r - mean2) * lax.rsqrt(var2 + eps) * g2_ref[...] + be2_ref[...]
    o_ref[...] = rn.astype(o_ref.dtype)


def block_epilogue(attn, residual, wo, bo, g1, be1, w1, b1, w2, b2, g2, be2,
                   eps=1e-5):
    m, d = attn.shape
    dff = w1.shape[1]
    cfg = _device_config()
    tm = _row_tile(m, cfg["row_tile"])
    row = lambda i: (i, 0)
    const = lambda i: (0, 0)
    return pl.pallas_call(
        functools.partial(_block_epilogue_kernel, eps=eps),
        out_shape=jax.ShapeDtypeStruct((m, d), jnp.bfloat16),
        grid=(pl.cdiv(m, tm),),
        in_specs=[pl.BlockSpec((tm, d), row),
                  pl.BlockSpec((tm, d), row),
                  pl.BlockSpec((d, d), const),
                  pl.BlockSpec((1, d), const),
                  pl.BlockSpec((1, d), const),
                  pl.BlockSpec((1, d), const),
                  pl.BlockSpec((d, dff), const),
                  pl.BlockSpec((1, dff), const),
                  pl.BlockSpec((dff, d), const),
                  pl.BlockSpec((1, d), const),
                  pl.BlockSpec((1, d), const),
                  pl.BlockSpec((1, d), const)],
        out_specs=pl.BlockSpec((tm, d), row),
        compiler_params=_compiler_params(("parallel",), cfg["vmem_limit"]),
    )(attn, residual, wo, bo, g1, be1, w1, b1, w2, b2, g2, be2)


# ---------------------------------------------------------------------------
# Kernel 3: standalone LayerNorm (final encoder norm), row-tiled
# ---------------------------------------------------------------------------

def _ln_kernel(x_ref, g_ref, b_ref, o_ref, *, eps):
    x = x_ref[...].astype(jnp.float32)
    mean = jnp.mean(x, axis=-1, keepdims=True)
    var = jnp.mean((x - mean) ** 2, axis=-1, keepdims=True)
    o_ref[...] = ((x - mean) * lax.rsqrt(var + eps) * g_ref[...]
                  + b_ref[...]).astype(o_ref.dtype)


def layernorm(x, gamma, beta, eps=1e-5, out_dtype=jnp.float32):
    m, d = x.shape
    cfg = _device_config()
    tm = _row_tile(m, cfg["row_tile"])
    row = lambda i: (i, 0)
    const = lambda i: (0, 0)
    return pl.pallas_call(
        functools.partial(_ln_kernel, eps=eps),
        out_shape=jax.ShapeDtypeStruct((m, d), out_dtype),
        grid=(pl.cdiv(m, tm),),
        in_specs=[pl.BlockSpec((tm, d), row),
                  pl.BlockSpec((1, d), const),
                  pl.BlockSpec((1, d), const)],
        out_specs=pl.BlockSpec((tm, d), row),
        compiler_params=_compiler_params(("parallel",), cfg["vmem_limit"]),
    )(x, gamma, beta)


# ---------------------------------------------------------------------------
# Encoder layer + encoder (thin JAX glue: contiguous reshapes only)
# ---------------------------------------------------------------------------

def encoder_layer_forward(src, pos, p, nhead, attn_map_dtype=jnp.float32):
    """src, pos: (B, S, D) bf16. p: kernel-ready layer params. Returns (src_out, attn_map)."""
    b, s, d = src.shape

    attn_out, attn_map = fused_self_attention(
        src, pos, p["w_qk"], p["b_qk"], p["w_v"], p["b_v"], nhead,
        attn_map_dtype=attn_map_dtype)

    x = block_epilogue(attn_out.reshape(b * s, d), src.reshape(b * s, d),
                       p["w_o"], p["b_o"], p["norm1_g"], p["norm1_b"],
                       p["w_1"], p["b_1"], p["w_2"], p["b_2"],
                       p["norm2_g"], p["norm2_b"])

    return x.reshape(b, s, d), attn_map


def transformer_encoder_forward(src, src_pos, layer_params, final_norm, nhead,
                                src_attn_mask=None, src_key_padding_mask=None,
                                attn_map_dtype=jnp.float32):
    if src_attn_mask is not None or src_key_padding_mask is not None:
        # TODO(synk): additive attn_mask / key_padding_mask support (mask the score matrix).
        raise NotImplementedError("attention masks are not supported in this kernel")
    output = src.astype(jnp.bfloat16)
    pos = src_pos.astype(jnp.bfloat16)
    list_attn_maps = []
    for p in layer_params:
        output, attn_map = encoder_layer_forward(output, pos, p, nhead,
                                                 attn_map_dtype=attn_map_dtype)
        list_attn_maps.append(attn_map)
    b, s, d = output.shape
    if final_norm is not None:
        output = layernorm(output.reshape(b * s, d),
                           final_norm["g"], final_norm["b"]).reshape(b, s, d)
    else:
        output = output.astype(jnp.float32)
    return output, list_attn_maps


# ---------------------------------------------------------------------------
# Parameters: PyTorch layout -> kernel-ready (pre-transposed, bf16 weights), done ONCE
# ---------------------------------------------------------------------------

def prepare_layer_params(raw):
    wq, wk, wv = jnp.split(raw["in_proj_w"], 3, axis=0)           # each (D, D)
    bq, bk, bv = jnp.split(raw["in_proj_b"], 3, axis=0)           # each (D,)
    row = lambda t: t.reshape(1, -1).astype(jnp.float32)
    return {
        "w_qk": jnp.concatenate([wq, wk], axis=0).T.astype(jnp.bfloat16),   # (D, 2D)
        "b_qk": row(jnp.concatenate([bq, bk])),
        "w_v": wv.T.astype(jnp.bfloat16),
        "b_v": row(bv),
        "w_o": raw["out_proj_w"].T.astype(jnp.bfloat16),
        "b_o": row(raw["out_proj_b"]),
        "w_1": raw["lin1_w"].T.astype(jnp.bfloat16),
        "b_1": row(raw["lin1_b"]),
        "w_2": raw["lin2_w"].T.astype(jnp.bfloat16),
        "b_2": row(raw["lin2_b"]),
        "norm1_g": row(raw["norm1_g"]), "norm1_b": row(raw["norm1_b"]),
        "norm2_g": row(raw["norm2_g"]), "norm2_b": row(raw["norm2_b"]),
    }


def prepare_final_norm(raw):
    return {"g": raw["g"].reshape(1, -1).astype(jnp.float32),
            "b": raw["b"].reshape(1, -1).astype(jnp.float32)}


def init_params(key, num_layers, d_model, nhead, dim_ff):
    layers = []
    for _ in range(num_layers):
        keys = jax.random.split(key, 5)
        key = keys[-1]
        layers.append({
            "in_proj_w": 0.05 * jax.random.normal(keys[0], (3 * d_model, d_model), jnp.float32),
            "in_proj_b": jnp.zeros((3 * d_model,), jnp.float32),
            "out_proj_w": 0.05 * jax.random.normal(keys[1], (d_model, d_model), jnp.float32),
            "out_proj_b": jnp.zeros((d_model,), jnp.float32),
            "lin1_w": 0.05 * jax.random.normal(keys[2], (dim_ff, d_model), jnp.float32),
            "lin1_b": jnp.zeros((dim_ff,), jnp.float32),
            "lin2_w": 0.05 * jax.random.normal(keys[3], (d_model, dim_ff), jnp.float32),
            "lin2_b": jnp.zeros((d_model,), jnp.float32),
            "norm1_g": jnp.ones((d_model,), jnp.float32),
            "norm1_b": jnp.zeros((d_model,), jnp.float32),
            "norm2_g": jnp.ones((d_model,), jnp.float32),
            "norm2_b": jnp.zeros((d_model,), jnp.float32),
        })
    final_norm = {"g": jnp.ones((d_model,), jnp.float32),
                  "b": jnp.zeros((d_model,), jnp.float32)}
    return layers, final_norm


# ---------------------------------------------------------------------------
# Pure-JAX f32 reference (mirrors the PyTorch module) for a correctness check
# ---------------------------------------------------------------------------

def _ln_ref(x, g, b, eps=1e-5):
    mean = jnp.mean(x, axis=-1, keepdims=True)
    var = jnp.mean((x - mean) ** 2, axis=-1, keepdims=True)
    return (x - mean) * lax.rsqrt(var + eps) * g + b


def reference_forward(src, pos, raw_layers, raw_final, nhead):
    x = src
    maps = []
    for raw in raw_layers:
        wq, wk, wv = jnp.split(raw["in_proj_w"], 3, axis=0)
        bq, bk, bv = jnp.split(raw["in_proj_b"], 3, axis=0)
        q = (x + pos) @ wq.T + bq
        k = (x + pos) @ wk.T + bk
        v = x @ wv.T + bv
        b, s, d = x.shape
        dh = d // nhead
        qh = q.reshape(b, s, nhead, dh).transpose(0, 2, 1, 3)
        kh = k.reshape(b, s, nhead, dh).transpose(0, 2, 1, 3)
        vh = v.reshape(b, s, nhead, dh).transpose(0, 2, 1, 3)
        scores = jnp.einsum("bhqd,bhkd->bhqk", qh, kh) / math.sqrt(dh)
        p = jax.nn.softmax(scores, axis=-1)
        maps.append(p.mean(axis=1))
        o = jnp.einsum("bhqk,bhkd->bhqd", p, vh).transpose(0, 2, 1, 3).reshape(b, s, d)
        o = o @ raw["out_proj_w"].T + raw["out_proj_b"]
        x = _ln_ref(x + o, raw["norm1_g"], raw["norm1_b"])
        ff = jnp.maximum(x @ raw["lin1_w"].T + raw["lin1_b"], 0.0)
        ff = ff @ raw["lin2_w"].T + raw["lin2_b"]
        x = _ln_ref(x + ff, raw["norm2_g"], raw["norm2_b"])
    if raw_final is not None:
        x = _ln_ref(x, raw_final["g"], raw_final["b"])
    return x, maps


# ---------------------------------------------------------------------------

if __name__ == "__main__":
    B, S, D = 2, 8, 32
    NHEAD = 4
    DFF = 64
    NUM_LAYERS = 2

    key = jax.random.PRNGKey(0)
    k_src, k_pos, k_par = jax.random.split(key, 3)
    src = jax.random.normal(k_src, (B, S, D), jnp.float32)
    src_pos = jax.random.normal(k_pos, (B, S, D), jnp.float32)

    raw_layers, raw_final = init_params(k_par, NUM_LAYERS, D, NHEAD, DFF)
    layer_params = [prepare_layer_params(p) for p in raw_layers]     # bf16 / transposed, once
    final_norm = prepare_final_norm(raw_final)

    fwd = jax.jit(functools.partial(transformer_encoder_forward, nhead=NHEAD))
    output, attn_maps = fwd(src, src_pos, layer_params, final_norm)

    output = jax.block_until_ready(output)
    attn_maps = [jax.block_until_ready(a) for a in attn_maps]

    assert output.shape == (B, S, D)
    assert output.dtype == jnp.float32
    assert len(attn_maps) == NUM_LAYERS
    assert all(a.shape == (B, S, S) for a in attn_maps)
    assert bool(jnp.all(jnp.isfinite(output)))
    # softmax rows of each head-averaged attn map must sum to ~1 (exact normalization)
    assert bool(jnp.allclose(attn_maps[0].sum(-1), 1.0, atol=1e-3))
    assert bool(jnp.allclose(attn_maps[-1].sum(-1), 1.0, atol=1e-3))

    # numerical check against the f32 reference (bf16 activations -> loose tolerance)
    ref_out, ref_maps = reference_forward(src, src_pos, raw_layers, raw_final, NHEAD)
    assert float(jnp.max(jnp.abs(output - ref_out))) < 0.15
    assert float(jnp.max(jnp.abs(attn_maps[-1] - ref_maps[-1]))) < 0.05

    print("KERNEL_OK")
</pallas_src>

<mosaic_0001>
module attributes {stable_mosaic.version = 11 : i64} {
  func.func @_attn_kernel(%arg0: i32, %arg1: i32, %arg2: memref<1x8x32xbf16, #tpu.memory_space<vmem>>, %arg3: memref<1x8x32xbf16, #tpu.memory_space<vmem>>, %arg4: memref<32x64xbf16, #tpu.memory_space<vmem>>, %arg5: memref<1x64xf32, #tpu.memory_space<vmem>>, %arg6: memref<32x32xbf16, #tpu.memory_space<vmem>>, %arg7: memref<1x32xf32, #tpu.memory_space<vmem>>, %arg8: memref<1x8x32xbf16, #tpu.memory_space<vmem>>, %arg9: memref<1x8x8xf32, #tpu.memory_space<vmem>>, %arg10: memref<8x32xbf16, #tpu.memory_space<vmem>>, %arg11: memref<8x32xbf16, #tpu.memory_space<vmem>>, %arg12: memref<8x32xbf16, #tpu.memory_space<vmem>>, %arg13: memref<8x32xf32, #tpu.memory_space<vmem>>) attributes {dimension_semantics = [#tpu.dimension_semantics<parallel>, #tpu.dimension_semantics<arbitrary>], iteration_bounds = array<i64: 2, 1>, scalar_prefetch = 0 : i64, scratch_operands = 4 : i64, tpu.core_type = #tpu.core_type<tc>, window_params = [{transform_indices = @transform_0, window_bounds = array<i64: 1, 8, 32>}, {transform_indices = @transform_1, window_bounds = array<i64: 1, 8, 32>}, {pipeline_mode = #tpu.pipeline_mode<synchronous>, transform_indices = @transform_2, window_bounds = array<i64: 32, 64>}, {pipeline_mode = #tpu.pipeline_mode<synchronous>, transform_indices = @transform_3, window_bounds = array<i64: 1, 64>}, {pipeline_mode = #tpu.pipeline_mode<synchronous>, transform_indices = @transform_4, window_bounds = array<i64: 32, 32>}, {pipeline_mode = #tpu.pipeline_mode<synchronous>, transform_indices = @transform_5, window_bounds = array<i64: 1, 32>}, {transform_indices = @transform_6, window_bounds = array<i64: 1, 8, 32>}, {transform_indices = @transform_7, window_bounds = array<i64: 1, 8, 8>}]} {
    %c0_i32 = arith.constant 0 : i32
    %0 = arith.cmpi eq, %arg1, %c0_i32 : i32
    %1 = arith.extui %0 : i1 to i32
    %c0_i32_0 = arith.constant 0 : i32
    %2 = arith.cmpi ne, %1, %c0_i32_0 : i32
    scf.if %2 {
      %c0_51 = arith.constant 0 : index
      %c0_52 = arith.constant 0 : index
      %c0_53 = arith.constant 0 : index
      %94 = vector.load %arg2[%c0_51, %c0_52, %c0_53] : memref<1x8x32xbf16, #tpu.memory_space<vmem>>, vector<1x8x32xbf16>
      %95 = vector.shape_cast %94 : vector<1x8x32xbf16> to vector<8x32xbf16>
      %c0_54 = arith.constant 0 : index
      %c0_55 = arith.constant 0 : index
      %c0_56 = arith.constant 0 : index
      %96 = vector.load %arg3[%c0_54, %c0_55, %c0_56] : memref<1x8x32xbf16, #tpu.memory_space<vmem>>, vector<1x8x32xbf16>
      %97 = vector.shape_cast %96 : vector<1x8x32xbf16> to vector<8x32xbf16>
      %98 = arith.addf %95, %97 : vector<8x32xbf16>
      %c0_57 = arith.constant 0 : index
      %c0_58 = arith.constant 0 : index
      %99 = vector.load %arg4[%c0_57, %c0_58] : memref<32x64xbf16, #tpu.memory_space<vmem>>, vector<32x64xbf16>
      %cst_59 = arith.constant dense<0.000000e+00> : vector<8x64xf32>
      %100 = tpu.matmul %98, %99, %cst_59 {dimension_numbers = #tpu.dot_dimension_numbers<[1], [0], [0], [1], [0, 0, 1, 1], [], []>} : vector<8x32xbf16>, vector<32x64xbf16>, vector<8x64xf32> -> vector<8x64xf32>
      %c0_60 = arith.constant 0 : index
      %c0_61 = arith.constant 0 : index
      %101 = vector.load %arg5[%c0_60, %c0_61] : memref<1x64xf32, #tpu.memory_space<vmem>>, vector<1x64xf32>
      %102 = vector.broadcast %101 : vector<1x64xf32> to vector<8x64xf32>
      %103 = arith.addf %100, %102 : vector<8x64xf32>
      %104 = vector.extract_strided_slice %103 {offsets = [0, 0], sizes = [8, 32], strides = [1, 1]} : vector<8x64xf32> to vector<8x32xf32>
      %105 = arith.truncf %104 : vector<8x32xf32> to vector<8x32xbf16>
      %c0_62 = arith.constant 0 : index
      %c0_63 = arith.constant 0 : index
      %106 = vector.load %arg10[%c0_62, %c0_63] : memref<8x32xbf16, #tpu.memory_space<vmem>>, vector<8x32xbf16>
      tpu.vector_store %arg10[%c0_62, %c0_63], %105 {strides = array<i32>} : memref<8x32xbf16, #tpu.memory_space<vmem>>, vector<8x32xbf16>,
      %107 = vector.extract_strided_slice %103 {offsets = [0, 32], sizes = [8, 32], strides = [1, 1]} : vector<8x64xf32> to vector<8x32xf32>
      %108 = arith.truncf %107 : vector<8x32xf32> to vector<8x32xbf16>
      %c0_64 = arith.constant 0 : index
      %c0_65 = arith.constant 0 : index
      %109 = vector.load %arg11[%c0_64, %c0_65] : memref<8x32xbf16, #tpu.memory_space<vmem>>, vector<8x32xbf16>
      tpu.vector_store %arg11[%c0_64, %c0_65], %108 {strides = array<i32>} : memref<8x32xbf16, #tpu.memory_space<vmem>>, vector<8x32xbf16>,
      %c0_66 = arith.constant 0 : index
      %c0_67 = arith.constant 0 : index
      %110 = vector.load %arg6[%c0_66, %c0_67] : memref<32x32xbf16, #tpu.memory_space<vmem>>, vector<32x32xbf16>
      %cst_68 = arith.constant dense<0.000000e+00> : vector<8x32xf32>
      %111 = tpu.matmul %95, %110, %cst_68 {dimension_numbers = #tpu.dot_dimension_numbers<[1], [0], [0], [1], [0, 0, 1, 1], [], []>} : vector<8x32xbf16>, vector<32x32xbf16>, vector<8x32xf32> -> vector<8x32xf32>
      %c0_69 = arith.constant 0 : index
      %c0_70 = arith.constant 0 : index
      %112 = vector.load %arg7[%c0_69, %c0_70] : memref<1x32xf32, #tpu.memory_space<vmem>>, vector<1x32xf32>
      %113 = vector.broadcast %112 : vector<1x32xf32> to vector<8x32xf32>
      %114 = arith.addf %111, %113 : vector<8x32xf32>
      %115 = arith.truncf %114 : vector<8x32xf32> to vector<8x32xbf16>
      %c0_71 = arith.constant 0 : index
      %c0_72 = arith.constant 0 : index
      %116 = vector.load %arg12[%c0_71, %c0_72] : memref<8x32xbf16, #tpu.memory_space<vmem>>, vector<8x32xbf16>
      tpu.vector_store %arg12[%c0_71, %c0_72], %115 {strides = array<i32>} : memref<8x32xbf16, #tpu.memory_space<vmem>>, vector<8x32xbf16>,
    } else {
    }
    %c8_i32 = arith.constant 8 : i32
    %3 = arith.muli %arg1, %c8_i32 : i32
    %4 = tpu.assume_multiple %3, 8 : i32
    %5 = arith.index_cast %4 : i32 to index
    %c0 = arith.constant 0 : index
    %6 = vector.load %arg10[%5, %c0] : memref<8x32xbf16, #tpu.memory_space<vmem>>, vector<8x32xbf16>
    %cst = arith.constant 0.000000e+00 : f32
    %7 = vector.broadcast %cst : f32 to vector<8x8xf32>
    %8 = vector.extract_strided_slice %6 {offsets = [0, 0], sizes = [8, 8], strides = [1, 1]} : vector<8x32xbf16> to vector<8x8xbf16>
    %c0_1 = arith.constant 0 : index
    %c0_2 = arith.constant 0 : index
    %9 = vector.load %arg11[%c0_1, %c0_2] : memref<8x32xbf16, #tpu.memory_space<vmem>>, vector<8x8xbf16>
    %c0_3 = arith.constant 0 : index
    %c0_4 = arith.constant 0 : index
    %10 = vector.load %arg12[%c0_3, %c0_4] : memref<8x32xbf16, #tpu.memory_space<vmem>>, vector<8x8xbf16>
    %cst_5 = arith.constant dense<0.000000e+00> : vector<8x8xf32>
    %11 = tpu.matmul %8, %9, %cst_5 {dimension_numbers = #tpu.dot_dimension_numbers<[1], [1], [0], [0], [0, 0, 1, 0], [], []>} : vector<8x8xbf16>, vector<8x8xbf16>, vector<8x8xf32> -> vector<8x8xf32>
    %cst_6 = arith.constant 0.353553385 : f32
    %12 = vector.broadcast %cst_6 : f32 to vector<8x8xf32>
    %13 = arith.mulf %11, %12 : vector<8x8xf32>
    %cst_7 = arith.constant dense<0xFF800000> : vector<8xf32>
    %14 = vector.multi_reduction <maximumf>, %13, %cst_7 [1] : vector<8x8xf32> to vector<8xf32>
    %15 = vector.shape_cast %14 : vector<8xf32> to vector<8x1xf32>
    %16 = vector.broadcast %15 : vector<8x1xf32> to vector<8x8xf32>
    %17 = arith.subf %13, %16 : vector<8x8xf32>
    %18 = math.exp %17 : vector<8x8xf32>
    %cst_8 = arith.constant dense<0.000000e+00> : vector<8xf32>
    %19 = vector.multi_reduction <add>, %18, %cst_8 [1] : vector<8x8xf32> to vector<8xf32>
    %20 = vector.shape_cast %19 : vector<8xf32> to vector<8x1xf32>
    %21 = vector.broadcast %20 : vector<8x1xf32> to vector<8x8xf32>
    %22 = arith.divf %18, %21 : vector<8x8xf32>
    %23 = arith.addf %7, %22 : vector<8x8xf32>
    %24 = arith.truncf %22 : vector<8x8xf32> to vector<8x8xbf16>
    %cst_9 = arith.constant dense<0.000000e+00> : vector<8x8xf32>
    %25 = tpu.matmul %24, %10, %cst_9 {dimension_numbers = #tpu.dot_dimension_numbers<[1], [0], [0], [1], [0, 0, 1, 1], [], []>} : vector<8x8xbf16>, vector<8x8xbf16>, vector<8x8xf32> -> vector<8x8xf32>
    %c0_10 = arith.constant 0 : index
    %c0_11 = arith.constant 0 : index
    %26 = vector.load %arg13[%c0_10, %c0_11] : memref<8x32xf32, #tpu.memory_space<vmem>>, vector<8x8xf32>
    tpu.vector_store %arg13[%c0_10, %c0_11], %25 {strides = array<i32>} : memref<8x32xf32, #tpu.memory_space<vmem>>, vector<8x8xf32>,
    %27 = vector.extract_strided_slice %6 {offsets = [0, 8], sizes = [8, 8], strides = [1, 1]} : vector<8x32xbf16> to vector<8x8xbf16>
    %c0_12 = arith.constant 0 : index
    %c8 = arith.constant 8 : index
    %28 = vector.load %arg11[%c0_12, %c8] : memref<8x32xbf16, #tpu.memory_space<vmem>>, vector<8x8xbf16>
    %c0_13 = arith.constant 0 : index
    %c8_14 = arith.constant 8 : index
    %29 = vector.load %arg12[%c0_13, %c8_14] : memref<8x32xbf16, #tpu.memory_space<vmem>>, vector<8x8xbf16>
    %cst_15 = arith.constant dense<0.000000e+00> : vector<8x8xf32>
    %30 = tpu.matmul %27, %28, %cst_15 {dimension_numbers = #tpu.dot_dimension_numbers<[1], [1], [0], [0], [0, 0, 1, 0], [], []>} : vector<8x8xbf16>, vector<8x8xbf16>, vector<8x8xf32> -> vector<8x8xf32>
    %cst_16 = arith.constant 0.353553385 : f32
    %31 = vector.broadcast %cst_16 : f32 to vector<8x8xf32>
    %32 = arith.mulf %30, %31 : vector<8x8xf32>
    %cst_17 = arith.constant dense<0xFF800000> : vector<8xf32>
    %33 = vector.multi_reduction <maximumf>, %32, %cst_17 [1] : vector<8x8xf32> to vector<8xf32>
    %34 = vector.shape_cast %33 : vector<8xf32> to vector<8x1xf32>
    %35 = vector.broadcast %34 : vector<8x1xf32> to vector<8x8xf32>
    %36 = arith.subf %32, %35 : vector<8x8xf32>
    %37 = math.exp %36 : vector<8x8xf32>
    %cst_18 = arith.constant dense<0.000000e+00> : vector<8xf32>
    %38 = vector.multi_reduction <add>, %37, %cst_18 [1] : vector<8x8xf32> to vector<8xf32>
    %39 = vector.shape_cast %38 : vector<8xf32> to vector<8x1xf32>
    %40 = vector.broadcast %39 : vector<8x1xf32> to vector<8x8xf32>
    %41 = arith.divf %37, %40 : vector<8x8xf32>
    %42 = arith.addf %23, %41 : vector<8x8xf32>
    %43 = arith.truncf %41 : vector<8x8xf32> to vector<8x8xbf16>
    %cst_19 = arith.constant dense<0.000000e+00> : vector<8x8xf32>
    %44 = tpu.matmul %43, %29, %cst_19 {dimension_numbers = #tpu.dot_dimension_numbers<[1], [0], [0], [1], [0, 0, 1, 1], [], []>} : vector<8x8xbf16>, vector<8x8xbf16>, vector<8x8xf32> -> vector<8x8xf32>
    %c0_20 = arith.constant 0 : index
    %c8_21 = arith.constant 8 : index
    %45 = vector.load %arg13[%c0_20, %c8_21] : memref<8x32xf32, #tpu.memory_space<vmem>>, vector<8x8xf32>
    tpu.vector_store %arg13[%c0_20, %c8_21], %44 {strides = array<i32>} : memref<8x32xf32, #tpu.memory_space<vmem>>, vector<8x8xf32>,
    %46 = vector.extract_strided_slice %6 {offsets = [0, 16], sizes = [8, 8], strides = [1, 1]} : vector<8x32xbf16> to vector<8x8xbf16>
    %c0_22 = arith.constant 0 : index
    %c16 = arith.constant 16 : index
    %47 = vector.load %arg11[%c0_22, %c16] : memref<8x32xbf16, #tpu.memory_space<vmem>>, vector<8x8xbf16>
    %c0_23 = arith.constant 0 : index
    %c16_24 = arith.constant 16 : index
    %48 = vector.load %arg12[%c0_23, %c16_24] : memref<8x32xbf16, #tpu.memory_space<vmem>>, vector<8x8xbf16>
    %cst_25 = arith.constant dense<0.000000e+00> : vector<8x8xf32>
    %49 = tpu.matmul %46, %47, %cst_25 {dimension_numbers = #tpu.dot_dimension_numbers<[1], [1], [0], [0], [0, 0, 1, 0], [], []>} : vector<8x8xbf16>, vector<8x8xbf16>, vector<8x8xf32> -> vector<8x8xf32>
    %cst_26 = arith.constant 0.353553385 : f32
    %50 = vector.broadcast %cst_26 : f32 to vector<8x8xf32>
    %51 = arith.mulf %49, %50 : vector<8x8xf32>
    %cst_27 = arith.constant dense<0xFF800000> : vector<8xf32>
    %52 = vector.multi_reduction <maximumf>, %51, %cst_27 [1] : vector<8x8xf32> to vector<8xf32>
    %53 = vector.shape_cast %52 : vector<8xf32> to vector<8x1xf32>
    %54 = vector.broadcast %53 : vector<8x1xf32> to vector<8x8xf32>
    %55 = arith.subf %51, %54 : vector<8x8xf32>
    %56 = math.exp %55 : vector<8x8xf32>
    %cst_28 = arith.constant dense<0.000000e+00> : vector<8xf32>
    %57 = vector.multi_reduction <add>, %56, %cst_28 [1] : vector<8x8xf32> to vector<8xf32>
    %58 = vector.shape_cast %57 : vector<8xf32> to vector<8x1xf32>
    %59 = vector.broadcast %58 : vector<8x1xf32> to vector<8x8xf32>
    %60 = arith.divf %56, %59 : vector<8x8xf32>
    %61 = arith.addf %42, %60 : vector<8x8xf32>
    %62 = arith.truncf %60 : vector<8x8xf32> to vector<8x8xbf16>
    %cst_29 = arith.constant dense<0.000000e+00> : vector<8x8xf32>
    %63 = tpu.matmul %62, %48, %cst_29 {dimension_numbers = #tpu.dot_dimension_numbers<[1], [0], [0], [1], [0, 0, 1, 1], [], []>} : vector<8x8xbf16>, vector<8x8xbf16>, vector<8x8xf32> -> vector<8x8xf32>
    %c0_30 = arith.constant 0 : index
    %c16_31 = arith.constant 16 : index
    %64 = vector.load %arg13[%c0_30, %c16_31] : memref<8x32xf32, #tpu.memory_space<vmem>>, vector<8x8xf32>
    tpu.vector_store %arg13[%c0_30, %c16_31], %63 {strides = array<i32>} : memref<8x32xf32, #tpu.memory_space<vmem>>, vector<8x8xf32>,
    %65 = vector.extract_strided_slice %6 {offsets = [0, 24], sizes = [8, 8], strides = [1, 1]} : vector<8x32xbf16> to vector<8x8xbf16>
    %c0_32 = arith.constant 0 : index
    %c24 = arith.constant 24 : index
    %66 = vector.load %arg11[%c0_32, %c24] : memref<8x32xbf16, #tpu.memory_space<vmem>>, vector<8x8xbf16>
    %c0_33 = arith.constant 0 : index
    %c24_34 = arith.constant 24 : index
    %67 = vector.load %arg12[%c0_33, %c24_34] : memref<8x32xbf16, #tpu.memory_space<vmem>>, vector<8x8xbf16>
    %cst_35 = arith.constant dense<0.000000e+00> : vector<8x8xf32>
    %68 = tpu.matmul %65, %66, %cst_35 {dimension_numbers = #tpu.dot_dimension_numbers<[1], [1], [0], [0], [0, 0, 1, 0], [], []>} : vector<8x8xbf16>, vector<8x8xbf16>, vector<8x8xf32> -> vector<8x8xf32>
    %cst_36 = arith.constant 0.353553385 : f32
    %69 = vector.broadcast %cst_36 : f32 to vector<8x8xf32>
    %70 = arith.mulf %68, %69 : vector<8x8xf32>
    %cst_37 = arith.constant dense<0xFF800000> : vector<8xf32>
    %71 = vector.multi_reduction <maximumf>, %70, %cst_37 [1] : vector<8x8xf32> to vector<8xf32>
    %72 = vector.shape_cast %71 : vector<8xf32> to vector<8x1xf32>
    %73 = vector.broadcast %72 : vector<8x1xf32> to vector<8x8xf32>
    %74 = arith.subf %70, %73 : vector<8x8xf32>
    %75 = math.exp %74 : vector<8x8xf32>
    %cst_38 = arith.constant dense<0.000000e+00> : vector<8xf32>
    %76 = vector.multi_reduction <add>, %75, %cst_38 [1] : vector<8x8xf32> to vector<8xf32>
    %77 = vector.shape_cast %76 : vector<8xf32> to vector<8x1xf32>
    %78 = vector.broadcast %77 : vector<8x1xf32> to vector<8x8xf32>
    %79 = arith.divf %75, %78 : vector<8x8xf32>
    %80 = arith.addf %61, %79 : vector<8x8xf32>
    %81 = arith.truncf %79 : vector<8x8xf32> to vector<8x8xbf16>
    %cst_39 = arith.constant dense<0.000000e+00> : vector<8x8xf32>
    %82 = tpu.matmul %81, %67, %cst_39 {dimension_numbers = #tpu.dot_dimension_numbers<[1], [0], [0], [1], [0, 0, 1, 1], [], []>} : vector<8x8xbf16>, vector<8x8xbf16>, vector<8x8xf32> -> vector<8x8xf32>
    %c0_40 = arith.constant 0 : index
    %c24_41 = arith.constant 24 : index
    %83 = vector.load %arg13[%c0_40, %c24_41] : memref<8x32xf32, #tpu.memory_space<vmem>>, vector<8x8xf32>
    tpu.vector_store %arg13[%c0_40, %c24_41], %82 {strides = array<i32>} : memref<8x32xf32, #tpu.memory_space<vmem>>, vector<8x8xf32>,
    %c0_42 = arith.constant 0 : index
    %c0_43 = arith.constant 0 : index
    %84 = vector.load %arg13[%c0_42, %c0_43] : memref<8x32xf32, #tpu.memory_space<vmem>>, vector<8x32xf32>
    %85 = arith.truncf %84 : vector<8x32xf32> to vector<8x32xbf16>
    %c0_44 = arith.constant 0 : index
    %c0_45 = arith.constant 0 : index
    %c0_46 = arith.constant 0 : index
    %86 = vector.load %arg8[%c0_44, %c0_45, %c0_46] : memref<1x8x32xbf16, #tpu.memory_space<vmem>>, vector<1x8x32xbf16>
    %87 = vector.shape_cast %86 : vector<1x8x32xbf16> to vector<8x32xbf16>
    %88 = vector.shape_cast %85 : vector<8x32xbf16> to vector<1x8x32xbf16>
    tpu.vector_store %arg8[%c0_44, %c0_45, %c0_46], %88 {strides = array<i32>} : memref<1x8x32xbf16, #tpu.memory_space<vmem>>, vector<1x8x32xbf16>,
    %cst_47 = arith.constant 2.500000e-01 : f32
    %89 = vector.broadcast %cst_47 : f32 to vector<8x8xf32>
    %90 = arith.mulf %80, %89 : vector<8x8xf32>
    %c0_48 = arith.constant 0 : index
    %c0_49 = arith.constant 0 : index
    %c0_50 = arith.constant 0 : index
    %91 = vector.load %arg9[%c0_48, %c0_49, %c0_50] : memref<1x8x8xf32, #tpu.memory_space<vmem>>, vector<1x8x8xf32>
    %92 = vector.shape_cast %91 : vector<1x8x8xf32> to vector<8x8xf32>
    %93 = vector.shape_cast %90 : vector<8x8xf32> to vector<1x8x8xf32>
    tpu.vector_store %arg9[%c0_48, %c0_49, %c0_50], %93 {strides = array<i32>} : memref<1x8x8xf32, #tpu.memory_space<vmem>>, vector<1x8x8xf32>,
    return
  }
  func.func @transform_0(%arg0: i32, %arg1: i32) -> (i32, i32, i32) {
    %c0_i32 = arith.constant 0 : i32
    %c0_i32_0 = arith.constant 0 : i32
    %c0_i32_1 = arith.constant 0 : i32
    return %arg0, %c0_i32, %c0_i32_0 : i32, i32, i32
  }
  func.func @transform_1(%arg0: i32, %arg1: i32) -> (i32, i32, i32) {
    %c0_i32 = arith.constant 0 : i32
    %c0_i32_0 = arith.constant 0 : i32
    %c0_i32_1 = arith.constant 0 : i32
    return %arg0, %c0_i32, %c0_i32_0 : i32, i32, i32
  }
  func.func @transform_2(%arg0: i32, %arg1: i32) -> (i32, i32) {
    %c0_i32 = arith.constant 0 : i32
    %c0_i32_0 = arith.constant 0 : i32
    %c0_i32_1 = arith.constant 0 : i32
    return %c0_i32, %c0_i32_0 : i32, i32
  }
  func.func @transform_3(%arg0: i32, %arg1: i32) -> (i32, i32) {
    %c0_i32 = arith.constant 0 : i32
    %c0_i32_0 = arith.constant 0 : i32
    %c0_i32_1 = arith.constant 0 : i32
    return %c0_i32, %c0_i32_0 : i32, i32
  }
  func.func @transform_4(%arg0: i32, %arg1: i32) -> (i32, i32) {
    %c0_i32 = arith.constant 0 : i32
    %c0_i32_0 = arith.constant 0 : i32
    %c0_i32_1 = arith.constant 0 : i32
    return %c0_i32, %c0_i32_0 : i32, i32
  }
  func.func @transform_5(%arg0: i32, %arg1: i32) -> (i32, i32) {
    %c0_i32 = arith.constant 0 : i32
    %c0_i32_0 = arith.constant 0 : i32
    %c0_i32_1 = arith.constant 0 : i32
    return %c0_i32, %c0_i32_0 : i32, i32
  }
  func.func @transform_6(%arg0: i32, %arg1: i32) -> (i32, i32, i32) {
    %c0_i32 = arith.constant 0 : i32
    %c0_i32_0 = arith.constant 0 : i32
    return %arg0, %arg1, %c0_i32 : i32, i32, i32
  }
  func.func @transform_7(%arg0: i32, %arg1: i32) -> (i32, i32, i32) {
    %c0_i32 = arith.constant 0 : i32
    %c0_i32_0 = arith.constant 0 : i32
    return %arg0, %arg1, %c0_i32 : i32, i32, i32
  }
}

module attributes {stable_mosaic.version = 11 : i64} {
  func.func @_block_epilogue_kernel(%arg0: i32, %arg1: memref<16x32xbf16, #tpu.memory_space<vmem>>, %arg2: memref<16x32xbf16, #tpu.memory_space<vmem>>, %arg3: memref<32x32xbf16, #tpu.memory_space<vmem>>, %arg4: memref<1x32xf32, #tpu.memory_space<vmem>>, %arg5: memref<1x32xf32, #tpu.memory_space<vmem>>, %arg6: memref<1x32xf32, #tpu.memory_space<vmem>>, %arg7: memref<32x64xbf16, #tpu.memory_space<vmem>>, %arg8: memref<1x64xf32, #tpu.memory_space<vmem>>, %arg9: memref<64x32xbf16, #tpu.memory_space<vmem>>, %arg10: memref<1x32xf32, #tpu.memory_space<vmem>>, %arg11: memref<1x32xf32, #tpu.memory_space<vmem>>, %arg12: memref<1x32xf32, #tpu.memory_space<vmem>>, %arg13: memref<16x32xbf16, #tpu.memory_space<vmem>>) attributes {dimension_semantics = [#tpu.dimension_semantics<parallel>], iteration_bounds = array<i64: 1>, scalar_prefetch = 0 : i64, scratch_operands = 0 : i64, tpu.core_type = #tpu.core_type<tc>, window_params = [{transform_indices = @transform_0, window_bounds = array<i64: 16, 32>}, {transform_indices = @transform_1, window_bounds = array<i64: 16, 32>}, {pipeline_mode = #tpu.pipeline_mode<synchronous>, transform_indices = @transform_2, window_bounds = array<i64: 32, 32>}, {pipeline_mode = #tpu.pipeline_mode<synchronous>, transform_indices = @transform_3, window_bounds = array<i64: 1, 32>}, {pipeline_mode = #tpu.pipeline_mode<synchronous>, transform_indices = @transform_4, window_bounds = array<i64: 1, 32>}, {pipeline_mode = #tpu.pipeline_mode<synchronous>, transform_indices = @transform_5, window_bounds = array<i64: 1, 32>}, {pipeline_mode = #tpu.pipeline_mode<synchronous>, transform_indices = @transform_6, window_bounds = array<i64: 32, 64>}, {pipeline_mode = #tpu.pipeline_mode<synchronous>, transform_indices = @transform_7, window_bounds = array<i64: 1, 64>}, {pipeline_mode = #tpu.pipeline_mode<synchronous>, transform_indices = @transform_8, window_bounds = array<i64: 64, 32>}, {pipeline_mode = #tpu.pipeline_mode<synchronous>, transform_indices = @transform_9, window_bounds = array<i64: 1, 32>}, {pipeline_mode = #tpu.pipeline_mode<synchronous>, transform_indices = @transform_10, window_bounds = array<i64: 1, 32>}, {pipeline_mode = #tpu.pipeline_mode<synchronous>, transform_indices = @transform_11, window_bounds = array<i64: 1, 32>}, {transform_indices = @transform_12, window_bounds = array<i64: 16, 32>}]} {
    %c0 = arith.constant 0 : index
    %c0_0 = arith.constant 0 : index
    %0 = vector.load %arg1[%c0, %c0_0] : memref<16x32xbf16, #tpu.memory_space<vmem>>, vector<16x32xbf16>
    %c0_1 = arith.constant 0 : index
    %c0_2 = arith.constant 0 : index
    %1 = vector.load %arg3[%c0_1, %c0_2] : memref<32x32xbf16, #tpu.memory_space<vmem>>, vector<32x32xbf16>
    %cst = arith.constant dense<0.000000e+00> : vector<16x32xf32>
    %2 = tpu.matmul %0, %1, %cst {dimension_numbers = #tpu.dot_dimension_numbers<[1], [0], [0], [1], [0, 0, 1, 1], [], []>} : vector<16x32xbf16>, vector<32x32xbf16>, vector<16x32xf32> -> vector<16x32xf32>
    %c0_3 = arith.constant 0 : index
    %c0_4 = arith.constant 0 : index
    %3 = vector.load %arg4[%c0_3, %c0_4] : memref<1x32xf32, #tpu.memory_space<vmem>>, vector<1x32xf32>
    %4 = vector.broadcast %3 : vector<1x32xf32> to vector<16x32xf32>
    %5 = arith.addf %2, %4 : vector<16x32xf32>
    %c0_5 = arith.constant 0 : index
    %c0_6 = arith.constant 0 : index
    %6 = vector.load %arg2[%c0_5, %c0_6] : memref<16x32xbf16, #tpu.memory_space<vmem>>, vector<16x32xbf16>
    %7 = arith.extf %6 : vector<16x32xbf16> to vector<16x32xf32>
    %8 = arith.addf %7, %5 : vector<16x32xf32>
    %cst_7 = arith.constant dense<0.000000e+00> : vector<16xf32>
    %9 = vector.multi_reduction <add>, %8, %cst_7 [1] : vector<16x32xf32> to vector<16xf32>
    %10 = vector.shape_cast %9 : vector<16xf32> to vector<16x1xf32>
    %cst_8 = arith.constant 3.200000e+01 : f32
    %11 = vector.broadcast %cst_8 : f32 to vector<16x1xf32>
    %12 = arith.divf %10, %11 : vector<16x1xf32>
    %13 = vector.broadcast %12 : vector<16x1xf32> to vector<16x32xf32>
    %14 = arith.subf %8, %13 : vector<16x32xf32>
    %15 = arith.mulf %14, %14 : vector<16x32xf32>
    %cst_9 = arith.constant dense<0.000000e+00> : vector<16xf32>
    %16 = vector.multi_reduction <add>, %15, %cst_9 [1] : vector<16x32xf32> to vector<16xf32>
    %17 = vector.shape_cast %16 : vector<16xf32> to vector<16x1xf32>
    %cst_10 = arith.constant 3.200000e+01 : f32
    %18 = vector.broadcast %cst_10 : f32 to vector<16x1xf32>
    %19 = arith.divf %17, %18 : vector<16x1xf32>
    %20 = vector.broadcast %12 : vector<16x1xf32> to vector<16x32xf32>
    %21 = arith.subf %8, %20 : vector<16x32xf32>
    %cst_11 = arith.constant 9.99999974E-6 : f32
    %22 = vector.broadcast %cst_11 : f32 to vector<16x1xf32>
    %23 = arith.addf %19, %22 : vector<16x1xf32>
    %24 = math.rsqrt %23 : vector<16x1xf32>
    %25 = vector.broadcast %24 : vector<16x1xf32> to vector<16x32xf32>
    %26 = arith.mulf %21, %25 : vector<16x32xf32>
    %c0_12 = arith.constant 0 : index
    %c0_13 = arith.constant 0 : index
    %27 = vector.load %arg5[%c0_12, %c0_13] : memref<1x32xf32, #tpu.memory_space<vmem>>, vector<1x32xf32>
    %28 = vector.broadcast %27 : vector<1x32xf32> to vector<16x32xf32>
    %29 = arith.mulf %26, %28 : vector<16x32xf32>
    %c0_14 = arith.constant 0 : index
    %c0_15 = arith.constant 0 : index
    %30 = vector.load %arg6[%c0_14, %c0_15] : memref<1x32xf32, #tpu.memory_space<vmem>>, vector<1x32xf32>
    %31 = vector.broadcast %30 : vector<1x32xf32> to vector<16x32xf32>
    %32 = arith.addf %29, %31 : vector<16x32xf32>
    %33 = arith.truncf %32 : vector<16x32xf32> to vector<16x32xbf16>
    %c0_16 = arith.constant 0 : index
    %c0_17 = arith.constant 0 : index
    %34 = vector.load %arg7[%c0_16, %c0_17] : memref<32x64xbf16, #tpu.memory_space<vmem>>, vector<32x64xbf16>
    %cst_18 = arith.constant dense<0.000000e+00> : vector<16x64xf32>
    %35 = tpu.matmul %33, %34, %cst_18 {dimension_numbers = #tpu.dot_dimension_numbers<[1], [0], [0], [1], [0, 0, 1, 1], [], []>} : vector<16x32xbf16>, vector<32x64xbf16>, vector<16x64xf32> -> vector<16x64xf32>
    %c0_19 = arith.constant 0 : index
    %c0_20 = arith.constant 0 : index
    %36 = vector.load %arg8[%c0_19, %c0_20] : memref<1x64xf32, #tpu.memory_space<vmem>>, vector<1x64xf32>
    %37 = vector.broadcast %36 : vector<1x64xf32> to vector<16x64xf32>
    %38 = arith.addf %35, %37 : vector<16x64xf32>
    %cst_21 = arith.constant 0.000000e+00 : f32
    %39 = vector.broadcast %cst_21 : f32 to vector<16x64xf32>
    %40 = arith.maximumf %38, %39 : vector<16x64xf32>
    %41 = arith.truncf %40 : vector<16x64xf32> to vector<16x64xbf16>
    %c0_22 = arith.constant 0 : index
    %c0_23 = arith.constant 0 : index
    %42 = vector.load %arg9[%c0_22, %c0_23] : memref<64x32xbf16, #tpu.memory_space<vmem>>, vector<64x32xbf16>
    %cst_24 = arith.constant dense<0.000000e+00> : vector<16x32xf32>
    %43 = tpu.matmul %41, %42, %cst_24 {dimension_numbers = #tpu.dot_dimension_numbers<[1], [0], [0], [1], [0, 0, 1, 1], [], []>} : vector<16x64xbf16>, vector<64x32xbf16>, vector<16x32xf32> -> vector<16x32xf32>
    %c0_25 = arith.constant 0 : index
    %c0_26 = arith.constant 0 : index
    %44 = vector.load %arg10[%c0_25, %c0_26] : memref<1x32xf32, #tpu.memory_space<vmem>>, vector<1x32xf32>
    %45 = vector.broadcast %44 : vector<1x32xf32> to vector<16x32xf32>
    %46 = arith.addf %43, %45 : vector<16x32xf32>
    %47 = arith.addf %32, %46 : vector<16x32xf32>
    %cst_27 = arith.constant dense<0.000000e+00> : vector<16xf32>
    %48 = vector.multi_reduction <add>, %47, %cst_27 [1] : vector<16x32xf32> to vector<16xf32>
    %49 = vector.shape_cast %48 : vector<16xf32> to vector<16x1xf32>
    %cst_28 = arith.constant 3.200000e+01 : f32
    %50 = vector.broadcast %cst_28 : f32 to vector<16x1xf32>
    %51 = arith.divf %49, %50 : vector<16x1xf32>
    %52 = vector.broadcast %51 : vector<16x1xf32> to vector<16x32xf32>
    %53 = arith.subf %47, %52 : vector<16x32xf32>
    %54 = arith.mulf %53, %53 : vector<16x32xf32>
    %cst_29 = arith.constant dense<0.000000e+00> : vector<16xf32>
    %55 = vector.multi_reduction <add>, %54, %cst_29 [1] : vector<16x32xf32> to vector<16xf32>
    %56 = vector.shape_cast %55 : vector<16xf32> to vector<16x1xf32>
    %cst_30 = arith.constant 3.200000e+01 : f32
    %57 = vector.broadcast %cst_30 : f32 to vector<16x1xf32>
    %58 = arith.divf %56, %57 : vector<16x1xf32>
    %59 = vector.broadcast %51 : vector<16x1xf32> to vector<16x32xf32>
    %60 = arith.subf %47, %59 : vector<16x32xf32>
    %cst_31 = arith.constant 9.99999974E-6 : f32
    %61 = vector.broadcast %cst_31 : f32 to vector<16x1xf32>
    %62 = arith.addf %58, %61 : vector<16x1xf32>
    %63 = math.rsqrt %62 : vector<16x1xf32>
    %64 = vector.broadcast %63 : vector<16x1xf32> to vector<16x32xf32>
    %65 = arith.mulf %60, %64 : vector<16x32xf32>
    %c0_32 = arith.constant 0 : index
    %c0_33 = arith.constant 0 : index
    %66 = vector.load %arg11[%c0_32, %c0_33] : memref<1x32xf32, #tpu.memory_space<vmem>>, vector<1x32xf32>
    %67 = vector.broadcast %66 : vector<1x32xf32> to vector<16x32xf32>
    %68 = arith.mulf %65, %67 : vector<16x32xf32>
    %c0_34 = arith.constant 0 : index
    %c0_35 = arith.constant 0 : index
    %69 = vector.load %arg12[%c0_34, %c0_35] : memref<1x32xf32, #tpu.memory_space<vmem>>, vector<1x32xf32>
    %70 = vector.broadcast %69 : vector<1x32xf32> to vector<16x32xf32>
    %71 = arith.addf %68, %70 : vector<16x32xf32>
    %72 = arith.truncf %71 : vector<16x32xf32> to vector<16x32xbf16>
    %c0_36 = arith.constant 0 : index
    %c0_37 = arith.constant 0 : index
    %73 = vector.load %arg13[%c0_36, %c0_37] : memref<16x32xbf16, #tpu.memory_space<vmem>>, vector<16x32xbf16>
    tpu.vector_store %arg13[%c0_36, %c0_37], %72 {strides = array<i32>} : memref<16x32xbf16, #tpu.memory_space<vmem>>, vector<16x32xbf16>,
    return
  }
  func.func @transform_0(%arg0: i32) -> (i32, i32) {
    %c0_i32 = arith.constant 0 : i32
    %c0_i32_0 = arith.constant 0 : i32
    return %arg0, %c0_i32 : i32, i32
  }
  func.func @transform_1(%arg0: i32) -> (i32, i32) {
    %c0_i32 = arith.constant 0 : i32
    %c0_i32_0 = arith.constant 0 : i32
    return %arg0, %c0_i32 : i32, i32
  }
  func.func @transform_2(%arg0: i32) -> (i32, i32) {
    %c0_i32 = arith.constant 0 : i32
    %c0_i32_0 = arith.constant 0 : i32
    %c0_i32_1 = arith.constant 0 : i32
    return %c0_i32, %c0_i32_0 : i32, i32
  }
  func.func @transform_3(%arg0: i32) -> (i32, i32) {
    %c0_i32 = arith.constant 0 : i32
    %c0_i32_0 = arith.constant 0 : i32
    %c0_i32_1 = arith.constant 0 : i32
    return %c0_i32, %c0_i32_0 : i32, i32
  }
  func.func @transform_4(%arg0: i32) -> (i32, i32) {
    %c0_i32 = arith.constant 0 : i32
    %c0_i32_0 = arith.constant 0 : i32
    %c0_i32_1 = arith.constant 0 : i32
    return %c0_i32, %c0_i32_0 : i32, i32
  }
  func.func @transform_5(%arg0: i32) -> (i32, i32) {
    %c0_i32 = arith.constant 0 : i32
    %c0_i32_0 = arith.constant 0 : i32
    %c0_i32_1 = arith.constant 0 : i32
    return %c0_i32, %c0_i32_0 : i32, i32
  }
  func.func @transform_6(%arg0: i32) -> (i32, i32) {
    %c0_i32 = arith.constant 0 : i32
    %c0_i32_0 = arith.constant 0 : i32
    %c0_i32_1 = arith.constant 0 : i32
    return %c0_i32, %c0_i32_0 : i32, i32
  }
  func.func @transform_7(%arg0: i32) -> (i32, i32) {
    %c0_i32 = arith.constant 0 : i32
    %c0_i32_0 = arith.constant 0 : i32
    %c0_i32_1 = arith.constant 0 : i32
    return %c0_i32, %c0_i32_0 : i32, i32
  }
  func.func @transform_8(%arg0: i32) -> (i32, i32) {
    %c0_i32 = arith.constant 0 : i32
    %c0_i32_0 = arith.constant 0 : i32
    %c0_i32_1 = arith.constant 0 : i32
    return %c0_i32, %c0_i32_0 : i32, i32
  }
  func.func @transform_9(%arg0: i32) -> (i32, i32) {
    %c0_i32 = arith.constant 0 : i32
    %c0_i32_0 = arith.constant 0 : i32
    %c0_i32_1 = arith.constant 0 : i32
    return %c0_i32, %c0_i32_0 : i32, i32
  }
  func.func @transform_10(%arg0: i32) -> (i32, i32) {
    %c0_i32 = arith.constant 0 : i32
    %c0_i32_0 = arith.constant 0 : i32
    %c0_i32_1 = arith.constant 0 : i32
    return %c0_i32, %c0_i32_0 : i32, i32
  }
  func.func @transform_11(%arg0: i32) -> (i32, i32) {
    %c0_i32 = arith.constant 0 : i32
    %c0_i32_0 = arith.constant 0 : i32
    %c0_i32_1 = arith.constant 0 : i32
    return %c0_i32, %c0_i32_0 : i32, i32
  }
  func.func @transform_12(%arg0: i32) -> (i32, i32) {
    %c0_i32 = arith.constant 0 : i32
    %c0_i32_0 = arith.constant 0 : i32
    return %arg0, %c0_i32 : i32, i32
  }
}

module attributes {stable_mosaic.version = 11 : i64} {
  func.func @_ln_kernel(%arg0: i32, %arg1: memref<16x32xbf16, #tpu.memory_space<vmem>>, %arg2: memref<1x32xf32, #tpu.memory_space<vmem>>, %arg3: memref<1x32xf32, #tpu.memory_space<vmem>>, %arg4: memref<16x32xf32, #tpu.memory_space<vmem>>) attributes {dimension_semantics = [#tpu.dimension_semantics<parallel>], iteration_bounds = array<i64: 1>, scalar_prefetch = 0 : i64, scratch_operands = 0 : i64, tpu.core_type = #tpu.core_type<tc>, window_params = [{transform_indices = @transform_0, window_bounds = array<i64: 16, 32>}, {pipeline_mode = #tpu.pipeline_mode<synchronous>, transform_indices = @transform_1, window_bounds = array<i64: 1, 32>}, {pipeline_mode = #tpu.pipeline_mode<synchronous>, transform_indices = @transform_2, window_bounds = array<i64: 1, 32>}, {transform_indices = @transform_3, window_bounds = array<i64: 16, 32>}]} {
    %c0 = arith.constant 0 : index
    %c0_0 = arith.constant 0 : index
    %0 = vector.load %arg1[%c0, %c0_0] : memref<16x32xbf16, #tpu.memory_space<vmem>>, vector<16x32xbf16>
    %1 = arith.extf %0 : vector<16x32xbf16> to vector<16x32xf32>
    %cst = arith.constant dense<0.000000e+00> : vector<16xf32>
    %2 = vector.multi_reduction <add>, %1, %cst [1] : vector<16x32xf32> to vector<16xf32>
    %3 = vector.shape_cast %2 : vector<16xf32> to vector<16x1xf32>
    %cst_1 = arith.constant 3.200000e+01 : f32
    %4 = vector.broadcast %cst_1 : f32 to vector<16x1xf32>
    %5 = arith.divf %3, %4 : vector<16x1xf32>
    %6 = vector.broadcast %5 : vector<16x1xf32> to vector<16x32xf32>
    %7 = arith.subf %1, %6 : vector<16x32xf32>
    %8 = arith.mulf %7, %7 : vector<16x32xf32>
    %cst_2 = arith.constant dense<0.000000e+00> : vector<16xf32>
    %9 = vector.multi_reduction <add>, %8, %cst_2 [1] : vector<16x32xf32> to vector<16xf32>
    %10 = vector.shape_cast %9 : vector<16xf32> to vector<16x1xf32>
    %cst_3 = arith.constant 3.200000e+01 : f32
    %11 = vector.broadcast %cst_3 : f32 to vector<16x1xf32>
    %12 = arith.divf %10, %11 : vector<16x1xf32>
    %13 = vector.broadcast %5 : vector<16x1xf32> to vector<16x32xf32>
    %14 = arith.subf %1, %13 : vector<16x32xf32>
    %cst_4 = arith.constant 9.99999974E-6 : f32
    %15 = vector.broadcast %cst_4 : f32 to vector<16x1xf32>
    %16 = arith.addf %12, %15 : vector<16x1xf32>
    %17 = math.rsqrt %16 : vector<16x1xf32>
    %18 = vector.broadcast %17 : vector<16x1xf32> to vector<16x32xf32>
    %19 = arith.mulf %14, %18 : vector<16x32xf32>
    %c0_5 = arith.constant 0 : index
    %c0_6 = arith.constant 0 : index
    %20 = vector.load %arg2[%c0_5, %c0_6] : memref<1x32xf32, #tpu.memory_space<vmem>>, vector<1x32xf32>
    %21 = vector.broadcast %20 : vector<1x32xf32> to vector<16x32xf32>
    %22 = arith.mulf %19, %21 : vector<16x32xf32>
    %c0_7 = arith.constant 0 : index
    %c0_8 = arith.constant 0 : index
    %23 = vector.load %arg3[%c0_7, %c0_8] : memref<1x32xf32, #tpu.memory_space<vmem>>, vector<1x32xf32>
    %24 = vector.broadcast %23 : vector<1x32xf32> to vector<16x32xf32>
    %25 = arith.addf %22, %24 : vector<16x32xf32>
    %c0_9 = arith.constant 0 : index
    %c0_10 = arith.constant 0 : index
    %26 = vector.load %arg4[%c0_9, %c0_10] : memref<16x32xf32, #tpu.memory_space<vmem>>, vector<16x32xf32>
    tpu.vector_store %arg4[%c0_9, %c0_10], %25 {strides = array<i32>} : memref<16x32xf32, #tpu.memory_space<vmem>>, vector<16x32xf32>,
    return
  }
  func.func @transform_0(%arg0: i32) -> (i32, i32) {
    %c0_i32 = arith.constant 0 : i32
    %c0_i32_0 = arith.constant 0 : i32
    return %arg0, %c0_i32 : i32, i32
  }
  func.func @transform_1(%arg0: i32) -> (i32, i32) {
    %c0_i32 = arith.constant 0 : i32
    %c0_i32_0 = arith.constant 0 : i32
    %c0_i32_1 = arith.constant 0 : i32
    return %c0_i32, %c0_i32_0 : i32, i32
  }
  func.func @transform_2(%arg0: i32) -> (i32, i32) {
    %c0_i32 = arith.constant 0 : i32
    %c0_i32_0 = arith.constant 0 : i32
    %c0_i32_1 = arith.constant 0 : i32
    return %c0_i32, %c0_i32_0 : i32, i32
  }
  func.func @transform_3(%arg0: i32) -> (i32, i32) {
    %c0_i32 = arith.constant 0 : i32
    %c0_i32_0 = arith.constant 0 : i32
    return %arg0, %c0_i32 : i32, i32
  }
}

</mosaic_0001>

<bundles_post_ra>
// kernel: transformer_encoder_forward.9
= control target key start
LH: loop header
LB: loop body
LE: loop exit
PB: predicated region body
PF: predicated region fallthrough
CT: control target
= control target key end

     0   :  { %vm19_vm0 = vcmask 261120   ;;  %s170_s0 = inlined_call_operand.vmem [shape: bf16[16,32], index: 0, kind: input, shape index: {}]   ;;  %s171_s1 = inlined_call_operand.vmem [shape: f32[1,32], index: 1, kind: input, shape index: {}]   ;;  %s172_s2 = inlined_call_operand.vmem [shape: f32[1,32], index: 2, kind: input, shape index: {}]   ;;  %s173_s3 = inlined_call_operand.hbm [shape: f32[16,32], index: 3, kind: output, shape index: {}]  }
   0x1   :  { %v86_v0 = vld [vmem:[%s170_s0] sm:$0xff]  }
   0x2   :  { %8 = vsyncpa [#allocation3], 0  ;;  %v87_v1 = vunpack.c.l.bf16 %v86_v0  ;;  %v88_v2 = vunpack.c.h.bf16 %v86_v0  ;;  %v83_v22 = vld [vmem:[%s171_s1] ss:$0 sm:$0xff]  ;;  %s120_s17 = smov [#allocation2]  }
   0x3   :  { %v84_v24 = vld [vmem:[%s172_s2] ss:$0 sm:$0xff]  ;;  %s72_s18 = sshll.u32 %s120_s17, 4  ;;  %s73_s18 = int_to_ptr.vmem [resolvable:$true] %s72_s18 }
   0x4   :  { %v20_v3 = vsel %vm19_vm0, %v87_v1, 0.0  ;;  %v23_v4 = vsel %vm19_vm0, %v88_v2, 0.0  ;;  %s96_s19 = scalar_lea.vmem %s73_s18, 256  ;;  %p101_p1 = scmp.lt.s32.totalorder %s73_s18, %s73_s18 }
   0x5   :  { %21 = vadd.xlane.f32.xlu0 %v20_v3  ;;  %p97_p0 = scmp.ne.s32.totalorder %s73_s18, %s96_s19  ;;  %p102_p2 = scmp.lt.s32.totalorder %s96_s19, %s96_s19 }
   0x7   :  { %p103_p3 = por %p102_p2, %p101_p1 }
   0x9   :  { %24 = vadd.xlane.f32.xlu0 %v23_v4  ;;  %p104_p4 = pnand %p103_p3, %p97_p0 }
  0x92   :  { %v22_v5 = vpop.xlane.xlu0 %21 }
  0x93   :  { %v27_v6 = vmul.f32 0.03125, %v22_v5 }
  0x95   :  { %v29_v7 = vsub.f32 %v87_v1, %v27_v6 }
  0x96   :  { %v25_v8 = vpop.xlane.xlu0 %24 }
  0x97   :  { %v28_v9 = vmul.f32 0.03125, %v25_v8  ;;  %v31_v10 = vmul.f32 %v29_v7, %v29_v7 }
  0x99   :  { %v30_v11 = vsub.f32 %v88_v2, %v28_v9  ;;  %v33_v12 = vsel %vm19_vm0, %v31_v10, 0.0 }
  0x9a   :  { %34 = vadd.xlane.f32.xlu1 %v33_v12 }
  0x9b   :  { %v32_v13 = vmul.f32 %v30_v11, %v30_v11 }
  0x9d   :  { %v36_v14 = vsel %vm19_vm0, %v32_v13, 0.0 }
  0x9e   :  { %37 = vadd.xlane.f32.xlu1 %v36_v14 }
 0x127   :  { %v35_v15 = vpop.xlane.xlu1 %34 }
 0x128   :  { %v39_v16 = vmul.f32 0.03125, %v35_v15 }
 0x12a   :  { %v41_v17 = vadd.f32 1e-05, %v39_v16 }
 0x12b   :  { %v38_v18 = vpop.xlane.xlu1 %37 }
 0x12c   :  { %92 = vrsqrt.f32 %v41_v17  ;;  %v40_v19 = vmul.f32 0.03125, %v38_v18 }
 0x12e   :  { %v42_v20 = vadd.f32 1e-05, %v40_v19 }
 0x130   :  { %94 = vrsqrt.f32 %v42_v20 }
 0x136   :  { %v93_v21 = vpop.eup %92 }
 0x137   :  { %v45_v23 = vmul.f32 %v93_v21, %v29_v7 }
 0x139   :  { %v54_v25 = vmul.f32 %v83_v22, %v45_v23 }
 0x13a   :  { %v95_v26 = vpop.eup %94 }
 0x13b   :  { %v46_v27 = vmul.f32 %v95_v26, %v30_v11  ;;  %v63_v28 = vadd.f32 %v84_v24, %v54_v25 }
 0x13d   :  { %v55_v29 = vmul.f32 %v83_v22, %v46_v27  ;;  %65 = vst.msk [vmem:[#allocation2] sm:$0xff] %vm19_vm0, %v63_v28 }
 0x13f   :  { %v64_v30 = vadd.f32 %v84_v24, %v55_v29 }
 0x141   :  { %66 = vst.msk [vmem:[#allocation2 + $0x8] sm:$0xff] %vm19_vm0, %v64_v30 }
 0x142   :  { %107 = shalt.err (!%p104_p4)
}
 0x143   :  { %s108_s20 = scalar_lea.hbm %s173_s3, 256 }
 0x144   :  { %p109_p5 = scmp.ne.s32.totalorder %s173_s3, %s108_s20  ;;  %p112_p6 = scmp.lt.u32.totalorder %s108_s20, %s173_s3 }
 0x146   :  { %p114_p7 = pnand %p112_p6, %p109_p5 }
 0x148   :  { %117 = shalt.err (!%p114_p7)
}
 0x149   :  { %s121_s25 = smov 128   ;;  %s122_s26 = smov 8  }
 0x14a   :  { %78 = dma.vmem_to_hbm [thread:$0]  %s73_s18, 256, %s173_s3, [#allocation3], %s121_s25, %s121_s25, %s122_s26  }
 0x14b   :  { %118 = dma.done.wait [#allocation3], 256  }
 0x14c   :  { %119 = vsyncadd [#allocation3], 4294967040 }
 0x14d   :  { %82 = vsyncpa [#allocation3], 1 }

// kernel: transformer_encoder_forward.6
= control target key start
LH: loop header
LB: loop body
LE: loop exit
PB: predicated region body
PF: predicated region fallthrough
CT: control target
= control target key end

     0   :  { %v469_v0 = vmov 0.0   ;;  %vm470_vm0 = vmmov 0   ;;  %vm72_vm1 = vcmask 261120   ;;  %vm278_vm2 = vcmask 523264   ;;  %s614_s2 = inlined_call_operand.vmem [shape: bf16[32,32], index: 2, kind: input, shape index: {}]   ;;  %s615_s0 = inlined_call_operand.vmem [shape: bf16[16,32], index: 0, kind: input, shape index: {}]   ;;  %s616_s1 = inlined_call_operand.vmem [shape: bf16[16,32], index: 1, kind: input, shape index: {}]   ;;  %s617_s3 = inlined_call_operand.vmem [shape: f32[1,32], index: 3, kind: input, shape index: {}]   ;;  %s618_s6 = inlined_call_operand.vmem [shape: bf16[32,64], index: 6, kind: input, shape index: {}]   ;;  %s619_s8 = inlined_call_operand.vmem [shape: bf16[64,32], index: 8, kind: input, shape index: {}]   ;;  %s620_s4 = inlined_call_operand.vmem [shape: f32[1,32], index: 4, kind: input, shape index: {}]   ;;  %s621_s5 = inlined_call_operand.vmem [shape: f32[1,32], index: 5, kind: input, shape index: {}]   ;;  %s622_s7 = inlined_call_operand.vmem [shape: f32[1,64], index: 7, kind: input, shape index: {}]   ;;  %s623_s9 = inlined_call_operand.vmem [shape: f32[1,32], index: 9, kind: input, shape index: {}]   ;;  %s624_s10 = inlined_call_operand.vmem [shape: f32[1,32], index: 10, kind: input, shape index: {}]   ;;  %s625_s11 = inlined_call_operand.vmem [shape: f32[1,32], index: 11, kind: input, shape index: {}]   ;;  %s626_s12 = inlined_call_operand.vmem [shape: bf16[16,32], index: 12, kind: output, shape index: {}]  }
   0x1   :  { %422 = vmatprep.subr.bf16.mxu1 %v469_v0  ;;  %v452_v1 = vld [vmem:[%s614_s2] sm:$0xff]   ;;  %426 = vmatprep.mubr.msk.bf16.mxu1 %vm470_vm0, %v469_v0  ;;  %v453_v2 = vld [vmem:[%s614_s2 + $0x8] sm:$0xff]   ;;  %v459_v49 = vld [vmem:[%s619_s8 + $0x10] sm:$0xff]   ;;  %vm377_vm3 = vcmask 257024  }
   0x2   :  { %438 = vmatprep.subr.bf16.mxu0 %v469_v0  ;;  %446 = vmatprep.mubr.msk.bf16.mxu0 %vm470_vm0, %v469_v0  ;;  %v454_v3 = vld [vmem:[%s615_s0] sm:$0xff]   ;;  %v456_v29 = vld [vmem:[%s618_s6 + $0x8] sm:$0xff]   ;;  %v460_v50 = vld [vmem:[%s619_s8 + $0x18] sm:$0xff]  }
   0x3   :  { %423 = vmatpush3.bf16.msra.mxu1 %v452_v1  ;;  %v408_v4 = vld [vmem:[%s616_s1] sm:$0xff]   ;;  %v458_v31 = vld [vmem:[%s619_s8 + $0x8] sm:$0xff]  }
   0x4   :  { %424 = vmatprep.subr.bf16.mxu1 %v469_v0  ;;  %v384_v5 = vld [vmem:[%s617_s3] ss:$0 sm:$0xff]  ;;  %v409_v6 = vunpack.c.l.bf16 %v408_v4  ;;  %v410_v10 = vunpack.c.h.bf16 %v408_v4 }
   0x5   :  { %v455_v28 = vld [vmem:[%s618_s6] sm:$0xff]  }
   0x6   :  { %v457_v30 = vld [vmem:[%s619_s8] sm:$0xff]  }
   0x7   :  { %425 = vmatpush3.bf16.msra.mxu1 %v453_v2  ;;  %439 = vmatpush3.bf16.msra.mxu0 %v457_v30  ;;  %v389_v40 = vld [vmem:[%s620_s4] ss:$0 sm:$0xff] }
   0x8   :  { %430 = vmatprep.subr.bf16.mxu1 %v469_v0  ;;  %440 = vmatprep.subr.bf16.mxu0 %v469_v0  ;;  %v390_v44 = vld [vmem:[%s621_s5] ss:$0 sm:$0xff] }
   0x9   :  { %v391_v51 = vld [vmem:[%s622_s7] ss:$0 sm:$0xff] }
   0xa   :  { %427 = vmatmul.mubr.msk.bf16.vlgmr.msra.gmra.mrb[0].mxu1 %vm72_vm1, %v454_v3  ;;  %v395_v61 = vld [vmem:[%s623_s9] ss:$0 sm:$0xff] }
   0xb   :  { %434 = vmatprep.mubr.msk.bf16.mxu1 %vm470_vm0, %v469_v0  ;;  %431 = vmatpush3.bf16.msra.mxu1 %v455_v28  ;;  %v402_v28 = vld [vmem:[%s625_s11] ss:$0 sm:$0xff] }
   0xc   :  { %432 = vmatprep.subr.bf16.mxu1 %v469_v0  ;;  %441 = vmatpush3.bf16.msra.mxu0 %v458_v31 }
   0xd   :  { %442 = vmatprep.subr.bf16.mxu0 %v469_v0 }
   0xf   :  { %433 = vmatpush3.bf16.msra.mxu1 %v456_v29 }
  0x10   :  { %443 = vmatpush3.bf16.msra.mxu0 %v459_v49 }
  0x11   :  { %444 = vmatprep.subr.bf16.mxu0 %v469_v0 }
  0x14   :  { %445 = vmatpush3.bf16.msra.mxu0 %v460_v50 }
  0xdd   :  { %v110_v7 = vpop.f32.mrb[0].mxu1 }
  0xde   :  { %v111_v8 = vadd.f32 %v384_v5, %v110_v7  ;;  %v428_v9 = vpop.f32.mrb[1].mxu1 }
  0xdf   :  { %v113_v11 = vpop.f32.mrb[2].mxu1 }
  0xe0   :  { %v114_v12 = vadd.f32 %v384_v5, %v113_v11  ;;  %v429_v13 = vpop.f32.mrb[3].mxu1  ;;  %v121_v14 = vadd.f32 %v409_v6, %v111_v8 }
  0xe2   :  { %v123_v15 = vsel %vm72_vm1, %v121_v14, 0.0  ;;  %v122_v16 = vadd.f32 %v410_v10, %v114_v12 }
  0xe3   :  { %124 = vadd.xlane.f32.xlu0 %v123_v15 }
  0xe4   :  { %v126_v17 = vsel %vm72_vm1, %v122_v16, 0.0 }
  0xe7   :  { %127 = vadd.xlane.f32.xlu0 %v126_v17 }
 0x170   :  { %v125_v18 = vpop.xlane.xlu0 %124 }
 0x171   :  { %v130_v19 = vmul.f32 0.03125, %v125_v18 }
 0x173   :  { %v132_v20 = vsub.f32 %v121_v14, %v130_v19 }
 0x174   :  { %v128_v21 = vpop.xlane.xlu0 %127 }
 0x175   :  { %v131_v22 = vmul.f32 0.03125, %v128_v21  ;;  %v134_v23 = vmul.f32 %v132_v20, %v132_v20 }
 0x177   :  { %v133_v24 = vsub.f32 %v122_v16, %v131_v22  ;;  %v136_v25 = vsel %vm72_vm1, %v134_v23, 0.0 }
 0x178   :  { %137 = vadd.xlane.f32.xlu1 %v136_v25  ;;  %v401_v25 = vld [vmem:[%s624_s10] ss:$0 sm:$0xff] }
 0x179   :  { %v135_v26 = vmul.f32 %v133_v24, %v133_v24 }
 0x17b   :  { %v139_v27 = vsel %vm72_vm1, %v135_v26, 0.0 }
 0x17c   :  { %140 = vadd.xlane.f32.xlu1 %v139_v27 }
 0x205   :  { %v138_v32 = vpop.xlane.xlu1 %137 }
 0x206   :  { %v142_v33 = vmul.f32 0.03125, %v138_v32 }
 0x208   :  { %v144_v34 = vadd.f32 1e-05, %v142_v33 }
 0x209   :  { %v141_v35 = vpop.xlane.xlu1 %140 }
 0x20a   :  { %461 = vrsqrt.f32 %v144_v34  ;;  %v143_v36 = vmul.f32 0.03125, %v141_v35 }
 0x20c   :  { %v145_v37 = vadd.f32 1e-05, %v143_v36 }
 0x20e   :  { %463 = vrsqrt.f32 %v145_v37 }
 0x214   :  { %v462_v38 = vpop.eup %461 }
 0x215   :  { %v148_v39 = vmul.f32 %v462_v38, %v132_v20 }
 0x217   :  { %v157_v42 = vmul.f32 %v389_v40, %v148_v39 }
 0x218   :  { %v464_v41 = vpop.eup %463 }
 0x219   :  { %v149_v43 = vmul.f32 %v464_v41, %v133_v24  ;;  %v166_v46 = vadd.f32 %v390_v44, %v157_v42 }
 0x21b   :  { %v158_v45 = vmul.f32 %v389_v40, %v149_v43 }
 0x21d   :  { %v167_v47 = vadd.f32 %v390_v44, %v158_v45 }
 0x21f   :  { %v168_v48 = vpack.c.bf16 %v167_v47, %v166_v46 }
 0x221   :  { %435 = vmatmul.mubr.msk.bf16.vlgmr.msra.gmra.mrb[4].mxu1 %vm72_vm1, %v168_v48 }
 0x2f4   :  { %v229_v52 = vpop.f32.mrb[4].mxu1 }
 0x2f5   :  { %v230_v53 = vadd.f32 %v391_v51, %v229_v52  ;;  %v436_v54 = vpop.f32.mrb[5].mxu1 }
 0x2f6   :  { %v232_v55 = vpop.f32.mrb[6].mxu1 }
 0x2f7   :  { %v233_v56 = vadd.f32 %v391_v51, %v232_v55  ;;  %v437_v57 = vpop.f32.mrb[7].mxu1  ;;  %v236_v58 = vmax.f32 %v230_v53, 0.0 }
 0x2f9   :  { %v237_v59 = vmax.f32 %v233_v56, 0.0 }
 0x2fb   :  { %v238_v60 = vpack.c.bf16 %v237_v59, %v236_v58 }
 0x2fd   :  { %447 = vmatmul.mubr.msk.bf16.vlgmr.msra.gmra.mrb[0].mxu0 %vm278_vm2, %v238_v60 }
 0x3d0   :  { %v316_v62 = vpop.f32.mrb[0].mxu0 }
 0x3d1   :  { %v317_v63 = vadd.f32 %v395_v61, %v316_v62  ;;  %v448_v0 = vpop.f32.mrb[1].mxu0 }
 0x3d2   :  { %v319_v1 = vpop.f32.mrb[2].mxu0 }
 0x3d3   :  { %v320_v2 = vadd.f32 %v395_v61, %v319_v1  ;;  %v449_v3 = vpop.f32.mrb[3].mxu0  ;;  %v323_v4 = vadd.f32 %v317_v63, %v166_v46 }
 0x3d5   :  { %v325_v5 = vsel %vm72_vm1, %v323_v4, 0.0  ;;  %v324_v6 = vadd.f32 %v320_v2, %v167_v47 }
 0x3d6   :  { %326 = vadd.xlane.f32.xlu0 %v325_v5 }
 0x3d7   :  { %v328_v7 = vsel %vm72_vm1, %v324_v6, 0.0 }
 0x3d8   :  { %329 = vadd.xlane.f32.xlu1 %v328_v7 }
 0x463   :  { %v327_v8 = vpop.xlane.xlu0 %326 }
 0x464   :  { %v331_v9 = vmul.f32 0.03125, %v327_v8 }
 0x465   :  { %v330_v10 = vpop.xlane.xlu1 %329 }
 0x466   :  { %v333_v11 = vsub.f32 %v323_v4, %v331_v9  ;;  %v332_v12 = vmul.f32 0.03125, %v330_v10 }
 0x468   :  { %v334_v13 = vsub.f32 %v324_v6, %v332_v12  ;;  %v335_v14 = vmul.f32 %v333_v11, %v333_v11 }
 0x46a   :  { %v337_v15 = vsel %vm72_vm1, %v335_v14, 0.0  ;;  %v336_v16 = vmul.f32 %v334_v13, %v334_v13 }
 0x46b   :  { %338 = vadd.xlane.f32.xlu0 %v337_v15 }
 0x46c   :  { %v340_v17 = vsel %vm72_vm1, %v336_v16, 0.0 }
 0x46d   :  { %341 = vadd.xlane.f32.xlu1 %v340_v17 }
 0x4f8   :  { %v339_v18 = vpop.xlane.xlu0 %338 }
 0x4f9   :  { %v343_v19 = vmul.f32 0.03125, %v339_v18 }
 0x4fa   :  { %v342_v20 = vpop.xlane.xlu1 %341 }
 0x4fb   :  { %v345_v21 = vadd.f32 1e-05, %v343_v19  ;;  %v344_v22 = vmul.f32 0.03125, %v342_v20 }
 0x4fd   :  { %465 = vrsqrt.f32 %v345_v21  ;;  %v346_v23 = vadd.f32 1e-05, %v344_v22 }
 0x4ff   :  { %467 = vrsqrt.f32 %v346_v23 }
 0x507   :  { %v466_v24 = vpop.eup %465 }
 0x508   :  { %v349_v26 = vmul.f32 %v466_v24, %v333_v11 }
 0x509   :  { %v468_v27 = vpop.eup %467 }
 0x50a   :  { %v358_v29 = vmul.f32 %v401_v25, %v349_v26  ;;  %v350_v30 = vmul.f32 %v468_v27, %v334_v13 }
 0x50c   :  { %v367_v31 = vadd.f32 %v402_v28, %v358_v29  ;;  %v359_v32 = vmul.f32 %v401_v25, %v350_v30 }
 0x50e   :  { %v405_v33 = vpack.c.bf16 %v367_v31, %v367_v31  ;;  %v368_v34 = vadd.f32 %v402_v28, %v359_v32 }
 0x510   :  { %378 = vst.msk [vmem:[%s626_s12] sm:$0xf] %vm377_vm3, %v405_v33  ;;  %v406_v35 = vpack.c.bf16 %v368_v34, %v368_v34 }
 0x512   :  { %379 = vst.msk [vmem:[%s626_s12 + $0x4] sm:$0xf] %vm377_vm3, %v406_v35 }

// kernel: transformer_encoder_forward.5
= control target key start
LH: loop header
LB: loop body
LE: loop exit
PB: predicated region body
PF: predicated region fallthrough
CT: control target
= control target key end

     0   :  { %13 = vsyncpa [#allocation7], 0  ;;  %s1682_s0 = inlined_call_operand.vmem [shape: bf16[2,8,32], index: 0, kind: input, shape index: {}]   ;;  %s1683_s1 = inlined_call_operand.vmem [shape: bf16[2,8,32], index: 1, kind: input, shape index: {}]   ;;  %s1684_s2 = inlined_call_operand.vmem [shape: bf16[32,64], index: 2, kind: input, shape index: {}]   ;;  %s1685_s3 = inlined_call_operand.vmem [shape: f32[1,64], index: 3, kind: input, shape index: {}]   ;;  %s1686_s4 = inlined_call_operand.vmem [shape: bf16[32,32], index: 4, kind: input, shape index: {}]   ;;  %s1687_s5 = inlined_call_operand.vmem [shape: f32[1,32], index: 5, kind: input, shape index: {}]   ;;  %s1688_s6 = inlined_call_operand.vmem [shape: bf16[2,8,32], index: 6, kind: output, shape index: {0}]   ;;  %s1689_s7 = inlined_call_operand.hbm [shape: f32[2,8,8], index: 7, kind: output, shape index: {1}]  }
   0x1   :  { %15 = vsyncpa [#allocation7 + $0x1], 0  ;;  %s1464_s24 = smov 0   ;;  %s1466_s25 = smov 0  }
   0x2   :  { %s1468_s26 = smov 0   ;;  %s1470_s27 = smov 0  }
   0x3   :  { %s1472_s28 = smov 0   ;;  %s1474_s29 = smov 0  }
   0x4 LB: > { %s1119_s30 = sadd.s32 4294967295, %s1412_s29   ;;  %s1120_s8 = sadd.s32 4294967294, %s1412_s29   ;;  %s1412_s29 = sphi %s1474_s29, %s21_s29   ;;  %s1408_s28 = sphi %s1472_s28, %s1696_s28   ;;  %s1404_s27 = sphi %s1470_s27, %s1695_s27   ;;  %s1400_s26 = sphi %s1468_s26, %s1694_s26   ;;  %s1396_s25 = sphi %s1466_s25, %s1693_s25   ;;  %s1392_s24 = sphi %s1464_s24, %s1692_s24  }
   0x5   : > { %s33_s9 = sadd.s32 1, %s1408_s28  ;;  %s206_s10 = sadd.s32 1, %s1400_s26 }
   0x6   : > { %p35_p0 = scmp.ge.s32.totalorder %s33_s9, 2  ;;  %p216_p1 = scmp.ne.s32.totalorder %s1400_s26, %s1396_s25 }
   0x7   : > { %p217_p2 = scmp.eq.s32.totalorder %s1119_s30, 1  ;;  %p222_p3 = scmp.ne.s32.totalorder %s1396_s25, %s1392_s24 }
   0x8   : > { %s1698_s9 = smov (%p35_p0, %s33_s9), 0  ;;  %p223_p5 = scmp.eq.s32.totalorder %s1120_s8, 1 }
   0x9   : > { %p1504_p4 = por %p217_p2, %p216_p1  ;;  %s201_s12 = ssub.s32 %s1408_s28, %s1698_s9 }
   0xa   : > { %p1123_p6 = scmp.ge.s32.totalorder %s1412_s29, 1  ;;  %p204_p7 = scmp.eq.s32.totalorder %s201_s12, 0 }
   0xb   : > { %p1511_p8 = por %p223_p5, %p222_p3  ;;  %p267_p9 = scmp.lt.s32.totalorder %s1412_s29, 3 }
   0xc   : > { %s1517_s14 = scalar_select %p204_p7, %s1400_s26, %s206_s10  }
   0xd   : > { %p268_p10 = pnand %p1123_p6, %p267_p9 }
   0xe   : > { %v1307_v0 = vld [vmem:[%s1684_s2] sm:$0xff] (!%p268_p10)   ;;  %v1414_v1 = vmov (!%p268_p10), 0.0   ;;  %v1308_v2 = vld [vmem:[%s1684_s2 + $0x8] sm:$0xff] (!%p268_p10)   ;;  %vm1415_vm0 = vmmov (!%p268_p10), 0   ;;  %p309_p11 = scmp.lt.s32.totalorder (!%p268_p10), %s1404_s27, 1  ;;  %vm355_vm1 = vcmask (!%p268_p10), 261120  }
   0xf   : > { %271 = sbr.rel (%p268_p10) target bundleno = 1414 (0x586), region = 44  ;;  %1179 = vmatprep.subr.bf16.mxu0 (!%p268_p10), %v1414_v1  ;;  %1187 = vmatprep.subr.bf16.mxu1 (!%p268_p10), %v1414_v1  ;;  %v1128_v6 = vld [vmem:[%s1685_s3] ss:$0 sm:$0xff] (!%p268_p10)  ;;  %vm400_vm2 = vcmask (!%p268_p10), 257024   ;;  %s1416_s16 = smov (!%p268_p10), 96   ;;  %vm485_vm3 = vcmask (!%p268_p10), 64512  }
  0x10   : > { %1180 = vmatpush3.bf16.msra.mxu0 (!%p268_p10), %v1307_v0  ;;  %1183 = vmatprep.mubr.msk.bf16.mxu0 (!%p268_p10), %vm1415_vm0, %v1414_v1  ;;  %s1417_s17 = smov (!%p268_p10), 120   ;;  %s1418_s18 = smov (!%p268_p10), 112   ;;  %v1313_v21 = vld [vmem:[%s1686_s4] sm:$0xff] (!%p268_p10)   ;;  %v1314_v22 = vld [vmem:[%s1686_s4 + $0x8] sm:$0xff] (!%p268_p10)   ;;  %vm549_vm4 = vcmask (!%p268_p10), 1043456  }
  0x11   : > { %1181 = vmatprep.subr.bf16.mxu0 (!%p268_p10), %v1414_v1  ;;  %1191 = vmatprep.mubr.msk.bf16.mxu1 (!%p268_p10), %vm1415_vm0, %v1414_v1  ;;  %v1133_v61 = vld [vmem:[%s1687_s5] ss:$0 sm:$0xff] (!%p268_p10)  ;;  %s306_s12 = sand.u32 (!%p268_p10), 1, %s1396_s25   ;;  %s1422_s8 = smov (!%p268_p10), 24  }
  0x12   : > { %1188 = vmatpush3.bf16.msra.mxu1 (!%p268_p10), %v1313_v21  ;;  %s1124_s15 = sshll.u32 (!%p268_p10), %s306_s12, 3 }
  0x13   : > { %1189 = vmatprep.subr.bf16.mxu1 (!%p268_p10), %v1414_v1 }
  0x14   : > { %1182 = vmatpush3.bf16.msra.mxu0 (!%p268_p10), %v1308_v2 }
  0x15   : > { %1195 = vmatprep.subr.bf16.mxu0 (!%p268_p10), %v1414_v1 }
  0x16   : > { %s310_s19 = scalar_select %p309_p11, %s1404_s27, 1  ;;  %1190 = vmatpush3.bf16.msra.mxu1 %v1314_v22 }
  0x17   : > { %1201 = vmatprep.subr.bf16.mxu1 %v1414_v1 }
  0x18   : > { %s1534_s20 = sshll.u32 %s310_s19, 2  ;;  %s1419_s19 = smov 104  }
  0x19   : > { %s312_s23 = scalar_lea.vmem %s1682_s0, %s1534_s20  ;;  %s316_s10 = scalar_lea.vmem %s1683_s1, %s1534_s20 }
  0x1a   : > { %v329_v3 = vld [vmem:[%s312_s23] sm:$0xf] }
  0x1b   : > { %v330_v4 = vld [vmem:[%s316_s10] sm:$0xf]  ;;  %1192 = vmatmul.mubr.msk.bf16.vlgmr.msra.gmra.mrb[0].mxu1 %vm355_vm1, %v329_v3  ;;  %s989_s10 = scalar_lea.sflag [#allocation7], %s306_s12 }
  0x1c   : > { %v331_v5 = vadd.bf16 %v330_v4, %v329_v3  ;;  %1203 = vmatprep.mubr.msk.bf16.mxu1 %vm1415_vm0, %v1414_v1 }
  0x1e   : > { %1184 = vmatmul.mubr.msk.bf16.vlgmr.msra.gmra.mrb[0].mxu0 %vm355_vm1, %v331_v5 }
  0x1f   : > { %1197 = vmatprep.mubr.msk.bf16.mxu0 %vm1415_vm0, %v1414_v1 }
  0xee   : > { %v469_v59 = vpop.f32.mrb[0].mxu1 }
  0xef   : > { %v1193_v60 = vpop.f32.mrb[1].mxu1  ;;  %v470_v63 = vadd.f32 %v1133_v61, %v469_v59 }
  0xf0   : > { %v472_v62 = vpop.f32.mrb[2].mxu1 }
  0xf1   : > { %v393_v7 = vpop.f32.mrb[0].mxu0  ;;  %v1194_v0 = vpop.f32.mrb[3].mxu1  ;;  %v475_v2 = vpack.c.bf16 %v470_v63, %v470_v63 }
  0xf2   : > { %v394_v8 = vadd.f32 %v1128_v6, %v393_v7  ;;  %v1185_v9 = vpop.f32.mrb[1].mxu0 }
  0xf3   : > { %v396_v10 = vpop.f32.mrb[2].mxu0  ;;  %476 = vst.msk [vmem:[#allocation4] sm:$0xf] %vm400_vm2, %v475_v2 }
  0xf4   : > { %v399_v11 = vpack.c.bf16 %v394_v8, %v394_v8  ;;  %v1186_v12 = vpop.f32.mrb[3].mxu0 }
  0xf6   : > { %401 = vst.msk [vmem:[#allocation2] sm:$0xf] %vm400_vm2, %v399_v11  ;;  %405 = vrot.lane.b32.xlu0 %v399_v11, %s1416_s16  ;;  %s308_s16 = scalar_lea.vmem [#allocation6], %s1124_s15 }
  0xf7   : > { %s1006_s30 = sshll.u32 %s308_s16, 4  ;;  %s1630_s30 = int_to_ptr.vmem [resolvable:$true] %s1006_s30 }
  0xf8   : > { %s1334_s15 = scalar_lea.vmem %s1630_s30, 128 }
  0xf9   : > { %p1335_p12 = scmp.ne.s32.totalorder %s1630_s30, %s1334_s15 }
  0xfa   : > { %v484_v5 = vld [vmem:[#allocation4] sm:$0xf] }
  0xfb   : > { %v551_v6 = vsel %vm549_vm4, %v484_v5, 0  ;;  %p1336_p13 = pnand %p1335_p12, %p1504_p4 }
  0xfc   : > { %1202 = vmatpush3.bf16.msra.mxu1 %v551_v6 }
  0xfd   : > { %v482_v13 = vld [vmem:[#allocation2] sm:$0xf]  ;;  %1213 = vmatprep.subr.bf16.mxu1 %v1414_v1  ;;  %p1337_p0 = pneg %p1336_p13 }
  0xfe   : > { %v1139_v14 = vcombine.low %v482_v13, %v482_v13 }
 0x100   : > { %599 = vrot.lane.b32.xlu1 %v1139_v14, %s1417_s17 }
 0x168   : > { %v406_v15 = vpop.permute.xlu0 %405 }
 0x169   : > { %408 = vst.msk [vmem:[#allocation3] sm:$0xf] %vm400_vm2, %v406_v15 }
 0x170   : > { %v483_v16 = vld [vmem:[#allocation3] sm:$0xf] }
 0x171   : > { %v1310_v17 = vld [vmem:[#allocation3] ss:$0 sps:$4 sm:$0xff]   ;;  %v490_v18 = vsel %vm485_vm3, %v483_v16, 0 }
 0x172   : > { %v1311_v19 = vld [vmem:[#allocation3] ss:$0 sps:$4 sm:$0xff]   ;;  %1196 = vmatpush3.bf16.xpose.msra.mxu0 %v490_v18  ;;  %604 = vrot.lane.b32.xlu0 %v1310_v17, %s1417_s17  ;;  %v600_v25 = vpop.permute.xlu1 %599  ;;  %v1315_v17 = vld [vmem:[#allocation4] ss:$0 sps:$4 sm:$0xff]  }
 0x173   : > { %730 = vrot.lane.b32.xlu1 %v1311_v19, %s1418_s18  ;;  %1207 = vmatprep.subr.bf16.mxu0 %v1414_v1  ;;  %v1312_v20 = vld [vmem:[#allocation3] ss:$0 sps:$4 sm:$0xff]  }
 0x176   : > { %725 = vrot.lane.b32.xlu0 %v1139_v14, %s1418_s18 }
 0x177   : > { %856 = vrot.lane.b32.xlu1 %v1312_v20, %s1419_s19  ;;  %v1316_v20 = vld [vmem:[#allocation4] ss:$0 sps:$4 sm:$0xff]  }
 0x179   : > { %1198 = vmatmul.mubr.msk.bf16.vlgmr.msra.gmra.mrb[4].mxu0 %vm485_vm3, %v482_v13 }
 0x17a   : > { %851 = vrot.lane.b32.xlu0 %v1139_v14, %s1419_s19  ;;  %1209 = vmatprep.mubr.msk.bf16.mxu0 %vm1415_vm0, %v1414_v1 }
 0x1e4   : > { %v605_v23 = vpop.permute.xlu0 %604 }
 0x1e5   : > { %v610_v24 = vsel %vm485_vm3, %v605_v23, 0  ;;  %v731_v26 = vpop.permute.xlu1 %730 }
 0x1e6   : > { %1208 = vmatpush3.bf16.xpose.msra.mxu0 %v610_v24  ;;  %v736_v27 = vsel %vm485_vm3, %v731_v26, 0 }
 0x1e7   : > { %1219 = vmatprep.subr.bf16.mxu0 %v1414_v1 }
 0x1e8   : > { %v726_v29 = vpop.permute.xlu0 %725 }
 0x1e9   : > { %v857_v28 = vpop.permute.xlu1 %856 }
 0x1ea   : > { %v862_v30 = vsel %vm485_vm3, %v857_v28, 0  ;;  %v1317_v28 = vld [vmem:[#allocation4] ss:$0 sps:$4 sm:$0xff]  }
 0x1ec   : > { %v852_v31 = vpop.permute.xlu0 %851 }
 0x1ed   : > { %1210 = vmatmul.mubr.msk.bf16.vlgmr.msra.gmra.mrb[8].mxu0 %vm485_vm3, %v600_v25 }
 0x1ee   : > { %1220 = vmatpush3.bf16.xpose.msra.mxu0 %v736_v27  ;;  %1221 = vmatprep.mubr.msk.bf16.mxu0 %vm1415_vm0, %v1414_v1 }
 0x1ef   : > { %1231 = vmatprep.subr.bf16.mxu0 %v1414_v1 }
 0x1f5   : > { %1222 = vmatmul.mubr.msk.bf16.vlgmr.msra.gmra.mrb[12].mxu0 %vm485_vm3, %v726_v29 }
 0x1f6   : > { %1232 = vmatpush3.bf16.xpose.msra.mxu0 %v862_v30  ;;  %1233 = vmatprep.mubr.msk.bf16.mxu0 %vm1415_vm0, %v1414_v1 }
 0x1fd   : > { %1234 = vmatmul.mubr.msk.bf16.vlgmr.msra.gmra.mrb[16].mxu0 %vm485_vm3, %v852_v31 }
 0x24c   : > { %v526_v32 = vpop.f32.mrb[4].mxu0 }
 0x24d   : > { %v532_v33 = vmul.f32 0.35355338, %v526_v32  ;;  %v1199_v34 = vpop.f32.mrb[5].mxu0 }
 0x24e   : > { %v529_v35 = vpop.f32.mrb[6].mxu0 }
 0x24f   : > { %v1200_v36 = vpop.f32.mrb[7].mxu0  ;;  %v533_v37 = vsel %vm485_vm3, %v532_v33, -inf }
 0x250   : > { %534 = vmax.xlane.f32.xlu1 %v533_v37 }
 0x2c0   : > { %v646_v38 = vpop.f32.mrb[8].mxu0 }
 0x2c1   : > { %v652_v39 = vmul.f32 0.35355338, %v646_v38  ;;  %v1211_v40 = vpop.f32.mrb[9].mxu0 }
 0x2c2   : > { %v649_v41 = vpop.f32.mrb[10].mxu0 }
 0x2c3   : > { %v1212_v42 = vpop.f32.mrb[11].mxu0  ;;  %v653_v43 = vsel %vm485_vm3, %v652_v39, -inf }
 0x2c4   : > { %654 = vmax.xlane.f32.xlu0 %v653_v43 }
 0x2c8   : > { %v772_v44 = vpop.f32.mrb[12].mxu0 }
 0x2c9   : > { %v778_v45 = vmul.f32 0.35355338, %v772_v44  ;;  %v1223_v46 = vpop.f32.mrb[13].mxu0 }
 0x2ca   : > { %v775_v47 = vpop.f32.mrb[14].mxu0 }
 0x2cb   : > { %v1224_v48 = vpop.f32.mrb[15].mxu0  ;;  %v779_v49 = vsel %vm485_vm3, %v778_v45, -inf }
 0x2cc   : > { %780 = vmax.xlane.f32.xlu0 %v779_v49 }
 0x2d0   : > { %v898_v50 = vpop.f32.mrb[16].mxu0 }
 0x2d1   : > { %v904_v51 = vmul.f32 0.35355338, %v898_v50  ;;  %v1235_v52 = vpop.f32.mrb[17].mxu0 }
 0x2d2   : > { %v901_v53 = vpop.f32.mrb[18].mxu0 }
 0x2d3   : > { %v1236_v54 = vpop.f32.mrb[19].mxu0  ;;  %v905_v55 = vsel %vm485_vm3, %v904_v51, -inf }
 0x2d4   : > { %906 = vmax.xlane.f32.xlu1 %v905_v55 }
 0x2dd   : > { %v535_v56 = vpop.xlane.xlu1 %534 }
 0x2de   : > { %v536_v57 = vsub.f32 %v532_v33, %v535_v56 }
 0x2e0   : > { %v537_v58 = vmul.f32 1.442695, %v536_v57 }
 0x2e2   : > { %1318 = vpow2.f32 %v537_v58 }
 0x2ec   : > { %v1319_v3 = vpop.eup %1318 }
 0x2ed   : > { %v539_v4 = vsel %vm485_vm3, %v1319_v3, 0.0 }
 0x2ee   : > { %540 = vadd.xlane.f32.xlu0 %v539_v4 }
 0x351   : > { %v655_v7 = vpop.xlane.xlu0 %654 }
 0x352   : > { %v656_v8 = vsub.f32 %v652_v39, %v655_v7 }
 0x354   : > { %v657_v9 = vmul.f32 1.442695, %v656_v8 }
 0x356   : > { %1320 = vpow2.f32 %v657_v9 }
 0x359   : > { %v781_v10 = vpop.xlane.xlu0 %780 }
 0x35a   : > { %v782_v11 = vsub.f32 %v778_v45, %v781_v10 }
 0x35c   : > { %v783_v12 = vmul.f32 1.442695, %v782_v11 }
 0x35e   : > { %1322 = vpow2.f32 %v783_v12 }
 0x360   : > { %v1321_v13 = vpop.eup %1320 }
 0x361   : > { %v659_v14 = vsel %vm485_vm3, %v1321_v13, 0.0  ;;  %v907_v19 = vpop.xlane.xlu1 %906 }
 0x362   : > { %660 = vadd.xlane.f32.xlu1 %v659_v14  ;;  %v908_v21 = vsub.f32 %v904_v51, %v907_v19 }
 0x364   : > { %v909_v22 = vmul.f32 1.442695, %v908_v21 }
 0x368   : > { %v1323_v15 = vpop.eup %1322 }
 0x369   : > { %v785_v16 = vsel %vm485_vm3, %v1323_v15, 0.0 }
 0x36a   : > { %786 = vadd.xlane.f32.xlu0 %v785_v16 }
 0x373   : > { %795 = vrot.lane.b32.xlu1 %v1315_v17, %s1418_s18  ;;  %s1421_s18 = smov 16  }
 0x37b   : > { %v541_v18 = vpop.xlane.xlu0 %540 }
 0x37c   : > { %1324 = vrcp.f32 %v541_v18 }
 0x37d   : > { %1326 = vpow2.f32 %v909_v22 }
 0x380   : > { %669 = vrot.lane.b32.xlu0 %v1316_v20, %s1417_s17  ;;  %s1420_s17 = smov 8  }
 0x386   : > { %v1325_v23 = vpop.eup %1324 }
 0x387   : > { %v543_v24 = vmul.f32 %v1325_v23, %v1319_v3  ;;  %v1327_v26 = vpop.eup %1326 }
 0x388   : > { %v911_v27 = vsel %vm485_vm3, %v1327_v26, 0.0 }
 0x389   : > { %v545_v25 = vpack.c.bf16 %v543_v24, %v543_v24 }
 0x38b   : > { %1204 = vmatmul.mubr.msk.bf16.vlgmr.msra.gmra.mrb[4].mxu1 %vm485_vm3, %v545_v25 }
 0x38c   : > { %1215 = vmatprep.mubr.msk.bf16.mxu1 %vm1415_vm0, %v1414_v1 }
 0x397   : > { %912 = vadd.xlane.f32.xlu1 %v911_v27 }
 0x3a8   : > { %921 = vrot.lane.b32.xlu1 %v1317_v28, %s1419_s19  ;;  %s1153_s19 = sshll.u32 %s1404_s27, 7  ;;  %s1423_s27 = smov [#allocation6]  }
 0x3a9   : > { %s1628_s23 = scalar_lea.hbm %s1689_s7, %s1153_s19 }
 0x3ef   : > { %v661_v29 = vpop.xlane.xlu1 %660 }
 0x3f0   : > { %1328 = vrcp.f32 %v661_v29 }
 0x3f3   : > { %v796_v35 = vpop.permute.xlu1 %795 }
 0x3f4   : > { %v801_v37 = vsel %vm549_vm4, %v796_v35, 0 }
 0x3f7   : > { %v787_v30 = vpop.xlane.xlu0 %786 }
 0x3f8   : > { %1330 = vrcp.f32 %v787_v30 }
 0x3fa   : > { %v1329_v31 = vpop.eup %1328 }
 0x3fb   : > { %v663_v32 = vmul.f32 %v1329_v31, %v1321_v13  ;;  %v670_v33 = vpop.permute.xlu0 %669 }
 0x3fc   : > { %v675_v34 = vsel %vm549_vm4, %v670_v33, 0 }
 0x3fd   : > { %1214 = vmatpush3.bf16.msra.mxu1 %v675_v34  ;;  %v665_v36 = vpack.c.bf16 %v663_v32, %v663_v32  ;;  %v664_v44 = vadd.f32 %v663_v32, %v543_v24 }
 0x3fe   : > { %1225 = vmatprep.subr.bf16.mxu1 %v1414_v1 }
 0x400   : > { %1216 = vmatmul.mubr.msk.bf16.vlgmr.msra.gmra.mrb[8].mxu1 %vm485_vm3, %v665_v36 }
 0x401   : > { %1226 = vmatpush3.bf16.msra.mxu1 %v801_v37  ;;  %1227 = vmatprep.mubr.msk.bf16.mxu1 %vm1415_vm0, %v1414_v1 }
 0x402   : > { %v1331_v38 = vpop.eup %1330  ;;  %1237 = vmatprep.subr.bf16.mxu1 %v1414_v1 }
 0x403   : > { %v789_v39 = vmul.f32 %v1331_v38, %v1323_v15 }
 0x405   : > { %v791_v40 = vpack.c.bf16 %v789_v39, %v789_v39  ;;  %v790_v47 = vadd.f32 %v789_v39, %v664_v44 }
 0x408   : > { %1228 = vmatmul.mubr.msk.bf16.vlgmr.msra.gmra.mrb[12].mxu1 %vm485_vm3, %v791_v40 }
 0x409   : > { %1239 = vmatprep.mubr.msk.bf16.mxu1 %vm1415_vm0, %v1414_v1 }
 0x424   : > { %v913_v41 = vpop.xlane.xlu1 %912 }
 0x425   : > { %1332 = vrcp.f32 %v913_v41 }
 0x428   : > { %v922_v42 = vpop.permute.xlu1 %921 }
 0x429   : > { %v927_v43 = vsel %vm549_vm4, %v922_v42, 0 }
 0x42a   : > { %1238 = vmatpush3.bf16.msra.mxu1 %v927_v43 }
 0x42f   : > { %v1333_v45 = vpop.eup %1332 }
 0x430   : > { %v915_v46 = vmul.f32 %v1333_v45, %v1327_v26 }
 0x432   : > { %v917_v48 = vpack.c.bf16 %v915_v46, %v915_v46  ;;  %v916_v49 = vadd.f32 %v915_v46, %v790_v47 }
 0x434   : > { %1240 = vmatmul.mubr.msk.bf16.vlgmr.msra.gmra.mrb[16].mxu1 %vm485_vm3, %v917_v48  ;;  %v979_v50 = vmul.f32 0.25, %v916_v49 }
 0x436   : > { %980 = vst.msk [vmem:[%s308_s16] sm:$0xff] %vm485_vm3, %v979_v50 }
 0x45e   : > { %v587_v1 = vpop.f32.mrb[4].mxu1 }
 0x45f   : > { %593 = vst.msk [vmem:[#allocation5] sm:$0xff] %vm485_vm3, %v587_v1  ;;  %v1205_v51 = vpop.f32.mrb[5].mxu1 }
 0x460   : > { %v590_v52 = vpop.f32.mrb[6].mxu1 }
 0x461   : > { %v1206_v53 = vpop.f32.mrb[7].mxu1 }
 0x4d3   : > { %v711_v54 = vpop.f32.mrb[8].mxu1 }
 0x4d4   : > { %718 = vrot.lane.b32.xlu0 %v711_v54, %s1420_s17  ;;  %v1217_v55 = vpop.f32.mrb[9].mxu1  ;;  %s1338_s17 = sshll.u32 %s1423_s27, 4  ;;  %s1339_s17 = int_to_ptr.vmem [resolvable:$false] %s1338_s17 }
 0x4d5   : > { %v714_v56 = vpop.f32.mrb[10].mxu1  ;;  %s1340_s16 = scalar_lea.vmem %s1339_s17, 256  ;;  %p1341_p1 = scmp.lt.s32.totalorder %s1630_s30, %s1339_s17 }
 0x4d6   : > { %v1218_v57 = vpop.f32.mrb[11].mxu1  ;;  %p1342_p2 = scmp.lt.s32.totalorder %s1340_s16, %s1334_s15 }
 0x4d8   : > { %p1343_p3 = por %p1342_p2, %p1341_p1 }
 0x4da   : > { %p1344_p5 = pnand %p1343_p3, %p1337_p0 }
 0x4db   : > { %v837_v58 = vpop.f32.mrb[12].mxu1 }
 0x4dc   : > { %844 = vrot.lane.b32.xlu1 %v837_v58, %s1421_s18  ;;  %v1229_v59 = vpop.f32.mrb[13].mxu1 }
 0x4dd   : > { %v840_v60 = vpop.f32.mrb[14].mxu1 }
 0x4de   : > { %v1230_v61 = vpop.f32.mrb[15].mxu1 }
 0x507   : > { %v963_v62 = vpop.f32.mrb[16].mxu1 }
 0x508   : > { %970 = vrot.lane.b32.xlu0 %v963_v62, %s1422_s8  ;;  %v1241_v63 = vpop.f32.mrb[17].mxu1 }
 0x509   : > { %1347 = shalt.err (!%p1344_p5)
}
 0x50a   : > { %s1348_s12 = scalar_lea.hbm %s1628_s23, 128  ;;  %s1352_s21 = scalar_lea.hbm %s1689_s7, 256 }
 0x50b   : > { %p1349_p6 = scmp.ne.s32.totalorder %s1628_s23, %s1348_s12  ;;  %p1353_p10 = scmp.lt.u32.totalorder %s1628_s23, %s1689_s7 }
 0x50c   : > { %p1354_p11 = scmp.lt.u32.totalorder %s1352_s21, %s1348_s12  ;;  %p1356_p13 = scmp.lt.u32.totalorder %s1348_s12, %s1628_s23 }
 0x50d   : > { %p1350_p7 = pnand %p1349_p6, %p1504_p4 }
 0x50e   : > { %p1355_p12 = por %p1354_p11, %p1353_p10 }
 0x50f   : > { %p1351_p9 = pneg %p1350_p7 }
 0x510   : > { %p1357_p0 = por %p1356_p13, %p1355_p12 }
 0x512   : > { %p1358_p1 = pnand %p1357_p0, %p1351_p9 }
 0x514   : > { %1361 = shalt.err (!%p1358_p1)
}
 0x515   : > { %1243 = dma.vmem_to_hbm [thread:$0]  (%p1504_p4), %s1630_s30, 128, %s1628_s23, %s989_s10   ;;  %v966_v0 = vpop.f32.mrb[18].mxu1  ;;  %vm721_vm5 = vcmask 130112   ;;  %vm847_vm6 = vcmask 195712   ;;  %vm973_vm7 = vcmask 261312  }
 0x516   : > { %v1242_v2 = vpop.f32.mrb[19].mxu1  ;;  %s323_s17 = scalar_lea.vmem %s1688_s6, %s1534_s20 }
 0x546   : > { %v719_v3 = vpop.permute.xlu0 %718 }
 0x547   : > { %722 = vst.msk [vmem:[#allocation5] sm:$0xff] %vm721_vm5, %v719_v3 }
 0x54e   : > { %v845_v4 = vpop.permute.xlu1 %844 }
 0x54f   : > { %848 = vst.msk [vmem:[#allocation5] sm:$0xff] %vm847_vm6, %v845_v4 }
 0x57a   : > { %v971_v5 = vpop.permute.xlu0 %970 }
 0x57b   : > { %974 = vst.msk [vmem:[#allocation5] sm:$0xff] %vm973_vm7, %v971_v5 }
 0x582   : > { %v975_v6 = vld [vmem:[#allocation5] sm:$0xff] }
 0x583   : > { %v976_v7 = vpack.c.bf16 %v975_v6, %v975_v6 }
 0x585   : > { %978 = vst.msk [vmem:[%s323_s17] sm:$0xf] %vm400_vm2, %v976_v7 }
 0x586 PF: > { %p1249_p4 = scmp.ge.s32.totalorder %s1412_s29, 2  ;;  %s1028_s11 = sand.u32 1, %s1392_s24  }
 0x587   : > { %s1029_s23 = scalar_lea.sflag [#allocation7], %s1028_s11 }
 0x588   : > { %p1246_p2 = pnand %p1249_p4, %p1511_p8 }
 0x58a   : > { %1387 = dma.done.wait (!%p1246_p2), %s1029_s23, 128  }
 0x58b   : > { %1389 = vsyncadd (!%p1246_p2), %s1029_s23, 4294967168  ;;  %s21_s29 = sadd.s32 1, %s1412_s29   ;;  %s1692_s24 = smov %s1396_s25 }
 0x58c   : > { %p18_p3 = scmp.ge.s32.totalorder %s21_s29, 4   ;;  %s1693_s25 = smov %s1400_s26 }
 0x58d   : > { %s1694_s26 = smov %s1517_s14  ;;  %s1695_s27 = smov %s1408_s28 }
 0x58e   : > { %s1696_s28 = smov %s1698_s9  ;;  %20 = sbr.rel (!%p18_p3) target bundleno = 4 (0x4), region = 99 }
 0x595   :  { %1034 = vsyncpa [#allocation7], 1 }
 0x596   :  { %1036 = vsyncpa [#allocation7 + $0x1], 1 }

</bundles_post_ra>
